<compile_context>
chip_gen: v5e
topology: v5e:2x2
jax: 0.10.0
libtpu: 0.0.40
codegen_flags: <defaults>
</compile_context>

<pallas_src>
import functools

import jax
import jax.numpy as jnp
from jax.experimental import pallas as pl
from jax.experimental.pallas import tpu as pltpu

_LANE = 128
_SUB = 8


def _round_up(a, b):
    return (a + b - 1) // b * b


def _cdiv(a, b):
    return (a + b - 1) // b


def _vmem_capacity_bytes():
    cap = 64 * 1024 * 1024                     # conservative fallback (v7x-sized)
    try:
        info = pltpu.get_tpu_info()
        cap = int(getattr(info, "vmem_capacity_bytes", cap) or cap)
    except Exception:
        pass
    return cap


def _pick_row_tile(Ho, W_p, Wo_p, Cin, Cp, dil, N, in_bytes, budget):
    """Largest sublane-aligned output-row tile TH that fits the VMEM budget."""
    cin_l = _round_up(Cin, _LANE)              # VMEM lane padding of the channel dim
    cp_l = _round_up(Cp, _LANE)
    wp8 = _round_up(W_p, _SUB)

    def vmem_bytes(th):
        x_blk = th * wp8 * cin_l * in_bytes                      # input row tile
        halo = 2 * dil * wp8 * cin_l * in_bytes                  # halo rows
        o_blk = th * Wo_p * cp_l * 4                             # f32 output tile
        inter = ((th + 2 * dil) * wp8 * cin_l * 4                # stitched strip (f32)
                 + th * Wo_p * cin_l * 4                         # depthwise accumulator
                 + th * Wo_p * cp_l * 4)                         # matmul result
        wgt = (9 + cp_l) * cin_l * 4 + cp_l * 4
        return 2 * (x_blk + halo + o_blk) + inter + wgt          # in/out double-buffered

    th = _round_up(max(Ho, 1), _SUB)
    while th > _SUB and vmem_bytes(th) > budget:
        th -= _SUB
    n_rt = _cdiv(Ho, th)
    if N == 1 and n_rt < 2 and Ho > _SUB:
        n_rt = 2          # v7x megacore: keep >= 2 parallel grid units per chip
    th = _round_up(_cdiv(Ho, n_rt), _SUB)      # rebalance so the last tile isn't padding
    return th, _cdiv(Ho, th)


# ------------------------------------------------------------------ Pallas kernel

def _dsconv_kernel(x_ref, halo_ref, wd_ref, wp_ref, b_ref, o_ref,
                   *, dil, th, wo, cin, cp):
    """Fused depthwise(3x3, dilation=dil) + pointwise(1x1) on one output-row tile.

    x_ref   : (1, th, W_p, cin)        input rows belonging to this row tile
    halo_ref: (1, 1, 2*dil, W_p, cin)  bottom halo rows for this tile
    wd_ref  : (9, cin)  f32            depthwise taps, t = dy*3 + dx
    wp_ref  : (cin, cp)                pointwise weight (f32 or bf16)
    b_ref   : (1, cp)   f32            fused bias (bd @ wp + bp)
    o_ref   : (1, th, wo, cp)
    """
    # Stitch the (th + 2*dil) rows this tile needs.  Concat is along the
    # outermost (row) axis -> pure vreg placement, no lane/sublane shuffle.
    xx = jnp.concatenate([x_ref[0], halo_ref[0, 0]], axis=0)      # (th+2d, W_p, cin)

    wd = wd_ref[...]                                              # (9, cin) f32

    # Depthwise: 3 row-strip loads (one per dy); the 3 dx shifts are static
    # in-register slices of the loaded strip.  f32 accumulation on the VPU.
    acc = jnp.zeros((th, wo, cin), jnp.float32)
    for dy in range(3):
        s_dy = xx[dy * dil:dy * dil + th].astype(jnp.float32)     # (th, W_p, cin)
        for dx in range(3):
            acc = acc + s_dy[:, dx * dil:dx * dil + wo, :] * wd[dy * 3 + dx]

    # Pointwise: one MXU matmul, f32 accumulate.  Depthwise bias is already
    # folded into b_ref by the wrapper.  wo % 8 == 0 -> reshapes are tile-aligned.
    lhs = acc.reshape(th * wo, cin).astype(wp_ref.dtype)
    y = jnp.dot(lhs, wp_ref[...], preferred_element_type=jnp.float32)
    y = y + b_ref[...]
    o_ref[...] = y.reshape(1, th, wo, cp).astype(o_ref.dtype)


# ------------------------------------------------------------------ wrappers

def depth_separable_conv2d_nhwc(x_nhwc, params, dilation=1, use_bf16=False):
    """NHWC-native fused forward (preferred entry point: no layout transposes).

    x_nhwc: (N, H, W, Cin) -> (N, Ho, Wo, Cout) float32.
    """
    wd = params["dw_w"]          # (Cin, 1, 3, 3)
    bd = params["dw_b"]          # (Cin,)
    wp = params["pw_w"]          # (Cout, Cin, 1, 1)
    bp = params["pw_b"]          # (Cout,)

    N, H, W, Cin = x_nhwc.shape
    Cout = wp.shape[0]
    dil = int(dilation)
    Ho, Wo = H - 2 * dil, W - 2 * dil
    assert Ho > 0 and Wo > 0, "input too small for 3x3 dilated valid conv"

    in_dtype = jnp.bfloat16 if use_bf16 else jnp.float32
    mm_dtype = jnp.bfloat16 if use_bf16 else jnp.float32
    in_bytes = 2 if use_bf16 else 4

    # Conditional output-channel lane padding: only when the extra writeback <= 25%.
    cp_pad = _round_up(Cout, _LANE)
    Cp = cp_pad if (cp_pad - Cout) * 4 <= Cout else Cout

    # Tiling derived from this generation's VMEM capacity.
    Wo_p = _round_up(Wo, _SUB)
    W_p = Wo_p + 2 * dil
    cap = _vmem_capacity_bytes()
    TH, n_rt = _pick_row_tile(Ho, W_p, Wo_p, Cin, Cp, dil, N, in_bytes,
                              budget=cap // 2)
    Ho_p = TH * n_rt
    H_p = Ho_p + 2 * dil

    # Input prep: cast + zero-pad bottom/right (padded outputs sliced off below).
    x = x_nhwc.astype(in_dtype)
    x = jnp.pad(x, ((0, 0), (0, H_p - H), (0, W_p - W), (0, 0)))

    # Halo rows: row tile r also needs input rows [(r+1)*TH, (r+1)*TH + 2*dil).
    # Pre-gather them into a tiny side input so the main input stays a plain,
    # non-overlapping, auto-pipelined row tile.
    halo_rows = (jnp.arange(n_rt)[:, None] + 1) * TH + jnp.arange(2 * dil)[None, :]
    x_halo = x[:, halo_rows]                          # (N, n_rt, 2*dil, W_p, Cin)

    # Weight / bias prep (layout plumbing stays outside the kernel).
    wd_k = jnp.transpose(wd[:, 0, :, :], (1, 2, 0)).reshape(9, Cin)
    wd_k = wd_k.astype(jnp.float32)                                  # (9, Cin)
    wp_mat = wp[:, :, 0, 0].T.astype(jnp.float32)                    # (Cin, Cout)
    b_fused = bd.astype(jnp.float32) @ wp_mat + bp.astype(jnp.float32)  # (Cout,)
    if Cp != Cout:
        wp_k = jnp.zeros((Cin, Cp), jnp.float32).at[:, :Cout].set(wp_mat)
        b_k = jnp.zeros((1, Cp), jnp.float32).at[:, :Cout].set(b_fused[None, :])
    else:
        wp_k = wp_mat
        b_k = b_fused.reshape(1, Cout)
    wp_k = wp_k.astype(mm_dtype)

    kern = functools.partial(_dsconv_kernel, dil=dil, th=TH, wo=Wo_p,
                             cin=Cin, cp=Cp)

    out = pl.pallas_call(
        kern,
        out_shape=jax.ShapeDtypeStruct((N, Ho_p, Wo_p, Cp), jnp.float32),
        grid=(N, n_rt),
        in_specs=[
            pl.BlockSpec((1, TH, W_p, Cin), lambda n, r: (n, r, 0, 0)),
            pl.BlockSpec((1, 1, 2 * dil, W_p, Cin), lambda n, r: (n, r, 0, 0, 0)),
            pl.BlockSpec((9, Cin), lambda n, r: (0, 0)),
            pl.BlockSpec((Cin, Cp), lambda n, r: (0, 0)),
            pl.BlockSpec((1, Cp), lambda n, r: (0, 0)),
        ],
        out_specs=pl.BlockSpec((1, TH, Wo_p, Cp), lambda n, r: (n, r, 0, 0)),
        compiler_params=pltpu.CompilerParams(
            dimension_semantics=("parallel", "parallel"),
            vmem_limit_bytes=int(cap * 0.85),
        ),
    )(x, x_halo, wd_k, wp_k, b_k)

    return out[:, :Ho, :Wo, :Cout]


def depth_separable_conv2d(x_nchw, params, dilation=1, use_bf16=False):
    """PyTorch-layout forward: x (N, Cin, H, W) -> (N, Cout, Ho, Wo) float32."""
    x_nhwc = jnp.transpose(x_nchw, (0, 2, 3, 1))
    out = depth_separable_conv2d_nhwc(x_nhwc, params, dilation, use_bf16)
    return jnp.transpose(out, (0, 3, 1, 2))


# ------------------------------------------------------------------ pure-JAX reference

def _reference(x_nchw, params, dilation=1):
    wd, bd, wp, bp = (params["dw_w"], params["dw_b"],
                      params["pw_w"], params["pw_b"])
    cin = x_nchw.shape[1]
    y = jax.lax.conv_general_dilated(
        x_nchw, wd, window_strides=(1, 1), padding="VALID",
        rhs_dilation=(dilation, dilation),
        dimension_numbers=("NCHW", "OIHW", "NCHW"),
        feature_group_count=cin)
    y = y + bd.reshape(1, -1, 1, 1)
    y = jax.lax.conv_general_dilated(
        y, wp, window_strides=(1, 1), padding="VALID",
        dimension_numbers=("NCHW", "OIHW", "NCHW"))
    return y + bp.reshape(1, -1, 1, 1)


# ------------------------------------------------------------------ main

if __name__ == "__main__":
    key = jax.random.PRNGKey(0)
    k1, k2, k3, k4, k5 = jax.random.split(key, 5)

    N, Cin, H, W = 2, 4, 16, 16
    Cout = 8

    x = jax.random.normal(k1, (N, Cin, H, W), jnp.float32)
    params = dict(
        dw_w=0.2 * jax.random.normal(k2, (Cin, 1, 3, 3), jnp.float32),
        dw_b=0.1 * jax.random.normal(k3, (Cin,), jnp.float32),
        pw_w=0.2 * jax.random.normal(k4, (Cout, Cin, 1, 1), jnp.float32),
        pw_b=0.1 * jax.random.normal(k5, (Cout,), jnp.float32),
    )

    # 1) f32 path, dilation=1 (single row tile per batch element).
    fwd1 = jax.jit(functools.partial(depth_separable_conv2d, dilation=1))
    out1 = fwd1(x, params)
    jax.block_until_ready(out1)
    ref1 = _reference(x, params, 1)
    assert out1.shape == (N, Cout, H - 2, W - 2), out1.shape
    assert bool(jnp.all(jnp.isfinite(out1)))
    assert bool(jnp.allclose(out1, ref1, atol=2e-4, rtol=2e-4)), \
        float(jnp.max(jnp.abs(out1 - ref1)))

    # 2) f32 path, dilation=2, batch=1 (exercises multi-row-tile halo stitching).
    x1 = x[:1]
    fwd2 = jax.jit(functools.partial(depth_separable_conv2d, dilation=2))
    out2 = fwd2(x1, params)
    jax.block_until_ready(out2)
    ref2 = _reference(x1, params, 2)
    assert out2.shape == (1, Cout, H - 4, W - 4), out2.shape
    assert bool(jnp.allclose(out2, ref2, atol=2e-4, rtol=2e-4)), \
        float(jnp.max(jnp.abs(out2 - ref2)))

    # 3) bf16 MXU path (v6e/v7x fast path), dilation=1, looser tolerance.
    fwd3 = jax.jit(functools.partial(depth_separable_conv2d, dilation=1,
                                     use_bf16=True))
    out3 = fwd3(x, params)
    jax.block_until_ready(out3)
    assert bool(jnp.all(jnp.isfinite(out3)))
    assert bool(jnp.allclose(out3, ref1, atol=2e-2, rtol=2e-2)), \
        float(jnp.max(jnp.abs(out3 - ref1)))

    print("KERNEL_OK")
</pallas_src>

<mosaic_0001>
module attributes {stable_mosaic.version = 11 : i64} {
  func.func @_dsconv_kernel(%arg0: i32, %arg1: i32, %arg2: memref<1x16x18x4xf32, #tpu.memory_space<vmem>>, %arg3: memref<1x1x2x18x4xf32, #tpu.memory_space<vmem>>, %arg4: memref<9x4xf32, #tpu.memory_space<vmem>>, %arg5: memref<4x8xf32, #tpu.memory_space<vmem>>, %arg6: memref<1x8xf32, #tpu.memory_space<vmem>>, %arg7: memref<1x16x16x8xf32, #tpu.memory_space<vmem>>) attributes {dimension_semantics = [#tpu.dimension_semantics<parallel>, #tpu.dimension_semantics<parallel>], iteration_bounds = array<i64: 2, 1>, scalar_prefetch = 0 : i64, scratch_operands = 0 : i64, tpu.core_type = #tpu.core_type<tc>, window_params = [{transform_indices = @transform_0, window_bounds = array<i64: 1, 16, 18, 4>}, {transform_indices = @transform_1, window_bounds = array<i64: 1, 1, 2, 18, 4>}, {pipeline_mode = #tpu.pipeline_mode<synchronous>, transform_indices = @transform_2, window_bounds = array<i64: 9, 4>}, {pipeline_mode = #tpu.pipeline_mode<synchronous>, transform_indices = @transform_3, window_bounds = array<i64: 4, 8>}, {pipeline_mode = #tpu.pipeline_mode<synchronous>, transform_indices = @transform_4, window_bounds = array<i64: 1, 8>}, {transform_indices = @transform_5, window_bounds = array<i64: 1, 16, 16, 8>}]} {
    %c0 = arith.constant 0 : index
    %c0_0 = arith.constant 0 : index
    %c0_1 = arith.constant 0 : index
    %c0_2 = arith.constant 0 : index
    %0 = vector.load %arg2[%c0, %c0_0, %c0_1, %c0_2] : memref<1x16x18x4xf32, #tpu.memory_space<vmem>>, vector<1x16x18x4xf32>
    %1 = vector.shape_cast %0 : vector<1x16x18x4xf32> to vector<16x18x4xf32>
    %c0_3 = arith.constant 0 : index
    %c0_4 = arith.constant 0 : index
    %c0_5 = arith.constant 0 : index
    %c0_6 = arith.constant 0 : index
    %c0_7 = arith.constant 0 : index
    %2 = vector.load %arg3[%c0_3, %c0_4, %c0_5, %c0_6, %c0_7] : memref<1x1x2x18x4xf32, #tpu.memory_space<vmem>>, vector<1x1x2x18x4xf32>
    %3 = vector.shape_cast %2 : vector<1x1x2x18x4xf32> to vector<2x18x4xf32>
    %4 = tpu.concatenate %1, %3 in 0 : vector<16x18x4xf32>, vector<2x18x4xf32> -> vector<18x18x4xf32>
    %c0_8 = arith.constant 0 : index
    %c0_9 = arith.constant 0 : index
    %5 = vector.load %arg4[%c0_8, %c0_9] : memref<9x4xf32, #tpu.memory_space<vmem>>, vector<9x4xf32>
    %cst = arith.constant 0.000000e+00 : f32
    %6 = vector.broadcast %cst : f32 to vector<16x16x4xf32>
    %7 = vector.extract_strided_slice %4 {offsets = [0, 0, 0], sizes = [16, 18, 4], strides = [1, 1, 1]} : vector<18x18x4xf32> to vector<16x18x4xf32>
    %8 = vector.extract_strided_slice %7 {offsets = [0, 0, 0], sizes = [16, 16, 4], strides = [1, 1, 1]} : vector<16x18x4xf32> to vector<16x16x4xf32>
    %9 = vector.extract_strided_slice %5 {offsets = [0, 0], sizes = [1, 4], strides = [1, 1]} : vector<9x4xf32> to vector<1x4xf32>
    %10 = vector.shape_cast %9 : vector<1x4xf32> to vector<4xf32>
    %11 = vector.shape_cast %10 : vector<4xf32> to vector<1x1x4xf32>
    %12 = vector.broadcast %11 : vector<1x1x4xf32> to vector<16x16x4xf32>
    %13 = arith.mulf %8, %12 : vector<16x16x4xf32>
    %14 = arith.addf %6, %13 : vector<16x16x4xf32>
    %15 = vector.extract_strided_slice %7 {offsets = [0, 1, 0], sizes = [16, 16, 4], strides = [1, 1, 1]} : vector<16x18x4xf32> to vector<16x16x4xf32>
    %16 = vector.extract_strided_slice %5 {offsets = [1, 0], sizes = [1, 4], strides = [1, 1]} : vector<9x4xf32> to vector<1x4xf32>
    %17 = vector.shape_cast %16 : vector<1x4xf32> to vector<4xf32>
    %18 = vector.shape_cast %17 : vector<4xf32> to vector<1x1x4xf32>
    %19 = vector.broadcast %18 : vector<1x1x4xf32> to vector<16x16x4xf32>
    %20 = arith.mulf %15, %19 : vector<16x16x4xf32>
    %21 = arith.addf %14, %20 : vector<16x16x4xf32>
    %22 = vector.extract_strided_slice %7 {offsets = [0, 2, 0], sizes = [16, 16, 4], strides = [1, 1, 1]} : vector<16x18x4xf32> to vector<16x16x4xf32>
    %23 = vector.extract_strided_slice %5 {offsets = [2, 0], sizes = [1, 4], strides = [1, 1]} : vector<9x4xf32> to vector<1x4xf32>
    %24 = vector.shape_cast %23 : vector<1x4xf32> to vector<4xf32>
    %25 = vector.shape_cast %24 : vector<4xf32> to vector<1x1x4xf32>
    %26 = vector.broadcast %25 : vector<1x1x4xf32> to vector<16x16x4xf32>
    %27 = arith.mulf %22, %26 : vector<16x16x4xf32>
    %28 = arith.addf %21, %27 : vector<16x16x4xf32>
    %29 = vector.extract_strided_slice %4 {offsets = [1, 0, 0], sizes = [16, 18, 4], strides = [1, 1, 1]} : vector<18x18x4xf32> to vector<16x18x4xf32>
    %30 = vector.extract_strided_slice %29 {offsets = [0, 0, 0], sizes = [16, 16, 4], strides = [1, 1, 1]} : vector<16x18x4xf32> to vector<16x16x4xf32>
    %31 = vector.extract_strided_slice %5 {offsets = [3, 0], sizes = [1, 4], strides = [1, 1]} : vector<9x4xf32> to vector<1x4xf32>
    %32 = vector.shape_cast %31 : vector<1x4xf32> to vector<4xf32>
    %33 = vector.shape_cast %32 : vector<4xf32> to vector<1x1x4xf32>
    %34 = vector.broadcast %33 : vector<1x1x4xf32> to vector<16x16x4xf32>
    %35 = arith.mulf %30, %34 : vector<16x16x4xf32>
    %36 = arith.addf %28, %35 : vector<16x16x4xf32>
    %37 = vector.extract_strided_slice %29 {offsets = [0, 1, 0], sizes = [16, 16, 4], strides = [1, 1, 1]} : vector<16x18x4xf32> to vector<16x16x4xf32>
    %38 = vector.extract_strided_slice %5 {offsets = [4, 0], sizes = [1, 4], strides = [1, 1]} : vector<9x4xf32> to vector<1x4xf32>
    %39 = vector.shape_cast %38 : vector<1x4xf32> to vector<4xf32>
    %40 = vector.shape_cast %39 : vector<4xf32> to vector<1x1x4xf32>
    %41 = vector.broadcast %40 : vector<1x1x4xf32> to vector<16x16x4xf32>
    %42 = arith.mulf %37, %41 : vector<16x16x4xf32>
    %43 = arith.addf %36, %42 : vector<16x16x4xf32>
    %44 = vector.extract_strided_slice %29 {offsets = [0, 2, 0], sizes = [16, 16, 4], strides = [1, 1, 1]} : vector<16x18x4xf32> to vector<16x16x4xf32>
    %45 = vector.extract_strided_slice %5 {offsets = [5, 0], sizes = [1, 4], strides = [1, 1]} : vector<9x4xf32> to vector<1x4xf32>
    %46 = vector.shape_cast %45 : vector<1x4xf32> to vector<4xf32>
    %47 = vector.shape_cast %46 : vector<4xf32> to vector<1x1x4xf32>
    %48 = vector.broadcast %47 : vector<1x1x4xf32> to vector<16x16x4xf32>
    %49 = arith.mulf %44, %48 : vector<16x16x4xf32>
    %50 = arith.addf %43, %49 : vector<16x16x4xf32>
    %51 = vector.extract_strided_slice %4 {offsets = [2, 0, 0], sizes = [16, 18, 4], strides = [1, 1, 1]} : vector<18x18x4xf32> to vector<16x18x4xf32>
    %52 = vector.extract_strided_slice %51 {offsets = [0, 0, 0], sizes = [16, 16, 4], strides = [1, 1, 1]} : vector<16x18x4xf32> to vector<16x16x4xf32>
    %53 = vector.extract_strided_slice %5 {offsets = [6, 0], sizes = [1, 4], strides = [1, 1]} : vector<9x4xf32> to vector<1x4xf32>
    %54 = vector.shape_cast %53 : vector<1x4xf32> to vector<4xf32>
    %55 = vector.shape_cast %54 : vector<4xf32> to vector<1x1x4xf32>
    %56 = vector.broadcast %55 : vector<1x1x4xf32> to vector<16x16x4xf32>
    %57 = arith.mulf %52, %56 : vector<16x16x4xf32>
    %58 = arith.addf %50, %57 : vector<16x16x4xf32>
    %59 = vector.extract_strided_slice %51 {offsets = [0, 1, 0], sizes = [16, 16, 4], strides = [1, 1, 1]} : vector<16x18x4xf32> to vector<16x16x4xf32>
    %60 = vector.extract_strided_slice %5 {offsets = [7, 0], sizes = [1, 4], strides = [1, 1]} : vector<9x4xf32> to vector<1x4xf32>
    %61 = vector.shape_cast %60 : vector<1x4xf32> to vector<4xf32>
    %62 = vector.shape_cast %61 : vector<4xf32> to vector<1x1x4xf32>
    %63 = vector.broadcast %62 : vector<1x1x4xf32> to vector<16x16x4xf32>
    %64 = arith.mulf %59, %63 : vector<16x16x4xf32>
    %65 = arith.addf %58, %64 : vector<16x16x4xf32>
    %66 = vector.extract_strided_slice %51 {offsets = [0, 2, 0], sizes = [16, 16, 4], strides = [1, 1, 1]} : vector<16x18x4xf32> to vector<16x16x4xf32>
    %67 = vector.extract_strided_slice %5 {offsets = [8, 0], sizes = [1, 4], strides = [1, 1]} : vector<9x4xf32> to vector<1x4xf32>
    %68 = vector.shape_cast %67 : vector<1x4xf32> to vector<4xf32>
    %69 = vector.shape_cast %68 : vector<4xf32> to vector<1x1x4xf32>
    %70 = vector.broadcast %69 : vector<1x1x4xf32> to vector<16x16x4xf32>
    %71 = arith.mulf %66, %70 : vector<16x16x4xf32>
    %72 = arith.addf %65, %71 : vector<16x16x4xf32>
    %73 = vector.shape_cast %72 : vector<16x16x4xf32> to vector<256x4xf32>
    %c0_10 = arith.constant 0 : index
    %c0_11 = arith.constant 0 : index
    %74 = vector.load %arg5[%c0_10, %c0_11] : memref<4x8xf32, #tpu.memory_space<vmem>>, vector<4x8xf32>
    %cst_12 = arith.constant dense<0.000000e+00> : vector<256x8xf32>
    %75 = tpu.matmul %73, %74, %cst_12 {dimension_numbers = #tpu.dot_dimension_numbers<[1], [0], [0], [1], [0, 0, 1, 1], [], []>} : vector<256x4xf32>, vector<4x8xf32>, vector<256x8xf32> -> vector<256x8xf32>
    %c0_13 = arith.constant 0 : index
    %c0_14 = arith.constant 0 : index
    %76 = vector.load %arg6[%c0_13, %c0_14] : memref<1x8xf32, #tpu.memory_space<vmem>>, vector<1x8xf32>
    %77 = vector.broadcast %76 : vector<1x8xf32> to vector<256x8xf32>
    %78 = arith.addf %75, %77 : vector<256x8xf32>
    %79 = vector.shape_cast %78 : vector<256x8xf32> to vector<1x16x16x8xf32>
    %c0_15 = arith.constant 0 : index
    %c0_16 = arith.constant 0 : index
    %c0_17 = arith.constant 0 : index
    %c0_18 = arith.constant 0 : index
    %80 = vector.load %arg7[%c0_15, %c0_16, %c0_17, %c0_18] : memref<1x16x16x8xf32, #tpu.memory_space<vmem>>, vector<1x16x16x8xf32>
    tpu.vector_store %arg7[%c0_15, %c0_16, %c0_17, %c0_18], %79 {strides = array<i32>} : memref<1x16x16x8xf32, #tpu.memory_space<vmem>>, vector<1x16x16x8xf32>,
    return
  }
  func.func @transform_0(%arg0: i32, %arg1: i32) -> (i32, i32, i32, i32) {
    %c0_i32 = arith.constant 0 : i32
    %c0_i32_0 = arith.constant 0 : i32
    %c0_i32_1 = arith.constant 0 : i32
    return %arg0, %arg1, %c0_i32, %c0_i32_0 : i32, i32, i32, i32
  }
  func.func @transform_1(%arg0: i32, %arg1: i32) -> (i32, i32, i32, i32, i32) {
    %c0_i32 = arith.constant 0 : i32
    %c0_i32_0 = arith.constant 0 : i32
    %c0_i32_1 = arith.constant 0 : i32
    %c0_i32_2 = arith.constant 0 : i32
    return %arg0, %arg1, %c0_i32, %c0_i32_0, %c0_i32_1 : i32, i32, i32, i32, i32
  }
  func.func @transform_2(%arg0: i32, %arg1: i32) -> (i32, i32) {
    %c0_i32 = arith.constant 0 : i32
    %c0_i32_0 = arith.constant 0 : i32
    %c0_i32_1 = arith.constant 0 : i32
    return %c0_i32, %c0_i32_0 : i32, i32
  }
  func.func @transform_3(%arg0: i32, %arg1: i32) -> (i32, i32) {
    %c0_i32 = arith.constant 0 : i32
    %c0_i32_0 = arith.constant 0 : i32
    %c0_i32_1 = arith.constant 0 : i32
    return %c0_i32, %c0_i32_0 : i32, i32
  }
  func.func @transform_4(%arg0: i32, %arg1: i32) -> (i32, i32) {
    %c0_i32 = arith.constant 0 : i32
    %c0_i32_0 = arith.constant 0 : i32
    %c0_i32_1 = arith.constant 0 : i32
    return %c0_i32, %c0_i32_0 : i32, i32
  }
  func.func @transform_5(%arg0: i32, %arg1: i32) -> (i32, i32, i32, i32) {
    %c0_i32 = arith.constant 0 : i32
    %c0_i32_0 = arith.constant 0 : i32
    %c0_i32_1 = arith.constant 0 : i32
    return %arg0, %arg1, %c0_i32, %c0_i32_0 : i32, i32, i32, i32
  }
}

</mosaic_0001>

<bundles_post_ra>
// kernel: depth_separable_conv2d.1
= control target key start
LH: loop header
LB: loop body
LE: loop exit
PB: predicated region body
PF: predicated region fallthrough
CT: control target
= control target key end

     0   :  { %s2570_s18 = smov 0   ;;  %s2572_s19 = smov 0   ;;  %s4578_s0 = inlined_call_operand.vmem [shape: f32[2,18,18,4], index: 0, kind: input, shape index: {}]   ;;  %s4579_s1 = inlined_call_operand.vmem [shape: f32[2,1,2,18,4], index: 1, kind: input, shape index: {}]   ;;  %s4580_s2 = inlined_call_operand.vmem [shape: f32[9,4], index: 2, kind: input, shape index: {}]   ;;  %s4581_s3 = inlined_call_operand.vmem [shape: f32[4,8], index: 3, kind: input, shape index: {}]   ;;  %s4582_s4 = inlined_call_operand.vmem [shape: f32[1,8], index: 4, kind: input, shape index: {}]   ;;  %s4583_s5 = inlined_call_operand.vmem [shape: f32[2,16,16,8], index: 5, kind: output, shape index: {}]  }
   0x1   :  { %s2574_s20 = smov 0  }
   0x2 LB: > { %s27_s21 = sadd.s32 1, %s2534_s19  ;;  %p2400_p0 = scmp.ge.s32.totalorder %s2538_s20, 1  ;;  %s2538_s20 = sphi %s2574_s20, %s15_s20   ;;  %s2534_s19 = sphi %s2572_s19, %s4916_s19   ;;  %s2530_s18 = sphi %s2570_s18, %s4915_s18  }
   0x3   : > { %p29_p1 = scmp.ge.s32.totalorder %s27_s21, 2  ;;  %p235_p2 = scmp.lt.s32.totalorder %s2538_s20, 3 }
   0x5   : > { %s4918_s21 = smov (%p29_p1, %s27_s21), 0  ;;  %p236_p3 = pnand %p2400_p0, %p235_p2 }
   0x7   : > { %239 = sbr.rel (%p236_p3) target bundleno = 462 (0x1ce), region = 40 }
   0xc   : > { %v2027_v0 = vld [vmem:[%s4581_s3] sm:$0xf]  ;;  %vm2129_vm0 = vcmask 1043456   ;;  %p293_p4 = scmp.lt.s32.totalorder %s2530_s18, 1  ;;  %vm546_vm1 = vcmask 1046528   ;;  %vm788_vm2 = vcmask 1045504  }
   0xd   : > { %2442 = vmatpush.msk.msra.mxu2 %vm2129_vm0, %v2027_v0  ;;  %2443 = vmatpush.msk.msra.mxu3 %vm2129_vm0, %v2027_v0  ;;  %v382_v1 = vld [vmem:[%s4580_s2] sm:$0xff]  ;;  %v2656_v27 = vld [vmem:[%s4580_s2 + $0x8] ss:$0 sm:$0xff]  ;;  %vm2032_vm3 = vcmask 31744   ;;  %vm2246_vm4 = vcmask 64512  }
   0xe   : > { %s4920_s18 = smov (!%p293_p4, %s2530_s18), 1  ;;  %2405 = vmatpush.msk.msra.mxu0 %vm2129_vm0, %v2027_v0  ;;  %2441 = vmatpush.msk.msra.mxu1 %vm2129_vm0, %v2027_v0  ;;  %v2597_v2 = vperm.slane %v382_v1, 0  ;;  %v2599_v3 = vperm.slane %v382_v1, 1  ;;  %v2601_v4 = vperm.slane %v382_v1, 2  ;;  %v2603_v5 = vperm.slane %v382_v1, 3 }
   0xf   : > { %s2444_s26 = smul.u32 432, %s4920_s18  ;;  %v2605_v6 = vperm.slane %v382_v1, 4  ;;  %v2612_v7 = vperm.slane %v382_v1, 5  ;;  %v2621_v11 = vperm.slane %v382_v1, 6  ;;  %v2623_v12 = vperm.slane %v382_v1, 7  ;;  %s2440_s15 = sshll.u32 %s4920_s18, 8 }
  0x10   : > { %s2445_s9 = smul.u32 48, %s4920_s18  ;;  %s4443_s23 = scalar_lea.vmem %s4583_s5, %s2440_s15 }
  0x11   : > { %s2610_s29 = scalar_lea.vmem %s4578_s0, %s2444_s26 }
  0x12   : > { %v352_v8 = vld [vmem:[%s2610_s29 + $0xc0] sm:$0xff]  ;;  %v2616_v9 = vld [vmem:[%s2610_s29 + $0xc8] sm:$0xff]  ;;  %v2619_v10 = vld [vmem:[%s2610_s29 + $0xd8] sm:$0xff]  ;;  %s3640_s12 = scalar_lea.vmem %s4579_s1, %s2445_s9 }
  0x13   : > { %4734 = vst [vmem:[#allocation2_spill] sm:$0xff] %v2619_v10  ;;  %v2626_v13 = vld [vmem:[%s2610_s29 + $0xe0] sm:$0xff]  ;;  %v401_v14 = vmul.f32 %v2597_v2, %v352_v8  ;;  %v474_v15 = vmul.f32 %v2599_v3, %v352_v8  ;;  %v2632_v16 = vmul.f32 %v2599_v3, %v2616_v9  ;;  %v716_v17 = vmul.f32 %v2601_v4, %v352_v8  ;;  %v2636_v18 = vld [vmem:[%s2610_s29 + $0xf0] sm:$0xff]  ;;  %v2659_v28 = vld [vmem:[%s2610_s29 + $0xf8] sm:$0xff] }
  0x14   : > { %4735 = vst [vmem:[#allocation3_spill] sm:$0xff] %v2636_v18  ;;  %v2640_v19 = vmul.f32 %v2601_v4, %v2616_v9  ;;  %v950_v20 = vmul.f32 %v2603_v5, %v2619_v10  ;;  %v1023_v21 = vmul.f32 %v2605_v6, %v2619_v10  ;;  %v2648_v22 = vmul.f32 %v2605_v6, %v2626_v13  ;;  %v364_v37 = vld [vmem:[%s2610_s29 + $0x120] sm:$0xff]  ;;  %v2683_v42 = vld [vmem:[%s2610_s29 + $0x128] sm:$0xff]  ;;  %v2699_v49 = vld [vmem:[%s2610_s29 + $0x138] sm:$0xff] }
  0x15   : > { %v587_v23 = vrot.slane %v474_v15, 1  ;;  %v4599_v24 = vrot.slane %v2632_v16, 1  ;;  %v829_v25 = vrot.slane %v716_v17, 2  ;;  %v1264_v26 = vmul.f32 %v2612_v7, %v2619_v10  ;;  %4736 = vst [vmem:[#allocation4_spill] sm:$0xff] %v2699_v49  ;;  %v2710_v57 = vld [vmem:[%s2610_s29 + $0x140] sm:$0xff]  ;;  %v2727_v8 = vld [vmem:[%s2610_s29 + $0x150] sm:$0xff] }
  0x16   : > { %v4596_v29 = vrot.slane %v2640_v19, 2  ;;  %v1135_v30 = vrot.slane %v1023_v21, 1  ;;  %v4595_v31 = vrot.slane %v2648_v22, 1  ;;  %v2665_v32 = vmul.f32 %v2612_v7, %v2626_v13  ;;  %4737 = vst [vmem:[#allocation5_spill] sm:$0xff] %v2727_v8 }
  0x17   : > { %v589_v33 = vsel %vm546_vm1, %v587_v23, %v4599_v24  ;;  %v1376_v34 = vrot.slane %v1264_v26, 2  ;;  %v1497_v35 = vmul.f32 %v2621_v11, %v2636_v18  ;;  %v1570_v36 = vmul.f32 %v2623_v12, %v2636_v18 }
  0x18   : > { %v675_v38 = vadd.f32 %v589_v33, %v401_v14  ;;  %v831_v39 = vsel %vm788_vm2, %v829_v25, %v4596_v29  ;;  %v1137_v40 = vsel %vm546_vm1, %v1135_v30, %v4595_v31  ;;  %v4594_v41 = vrot.slane %v2665_v32, 2  ;;  %v2859_v29 = vld [vmem:[%s2610_s29 + $0x78] sm:$0xff] }
  0x19   : > { %v2687_v43 = vmul.f32 %v2623_v12, %v2659_v28  ;;  %v1682_v44 = vrot.slane %v1570_v36, 1  ;;  %v1811_v45 = vmul.f32 %v2656_v27, %v2636_v18  ;;  %v2693_v46 = vmul.f32 %v2656_v27, %v2659_v28  ;;  %4740 = vst [vmem:[#allocation8_spill] sm:$0xff] %v2859_v29 }
  0x1a   : > { %v917_v47 = vadd.f32 %v831_v39, %v675_v38  ;;  %v1378_v48 = vsel %vm788_vm2, %v1376_v34, %v4594_v41  ;;  %v409_v50 = vmul.f32 %v2597_v2, %v364_v37  ;;  %v486_v51 = vmul.f32 %v2599_v3, %v364_v37 }
  0x1b   : > { %v4593_v52 = vrot.slane %v2687_v43, 1  ;;  %v1923_v53 = vrot.slane %v1811_v45, 2  ;;  %v4590_v54 = vrot.slane %v2693_v46, 2  ;;  %v2707_v55 = vmul.f32 %v2599_v3, %v2683_v42 }
  0x1c   : > { %v982_v56 = vadd.f32 %v950_v20, %v917_v47  ;;  %v607_v58 = vrot.slane %v486_v51, 1  ;;  %v728_v59 = vmul.f32 %v2601_v4, %v364_v37  ;;  %v2715_v60 = vmul.f32 %v2601_v4, %v2683_v42  ;;  %v2733_v20 = vld [vmem:[%s2610_s29 + $0x158] sm:$0xff] }
  0x1d   : > { %v1684_v61 = vsel %vm546_vm1, %v1682_v44, %v4593_v52  ;;  %v1925_v62 = vsel %vm788_vm2, %v1923_v53, %v4590_v54  ;;  %v4589_v63 = vrot.slane %v2707_v55, 1  ;;  %v958_v0 = vmul.f32 %v2603_v5, %v2699_v49 }
  0x1e   : > { %v1223_v1 = vadd.f32 %v1137_v40, %v982_v56  ;;  %v849_v14 = vrot.slane %v728_v59, 2  ;;  %v4588_v15 = vrot.slane %v2715_v60, 2  ;;  %v1035_v17 = vmul.f32 %v2605_v6, %v2699_v49 }
  0x1f   : > { %v609_v21 = vsel %vm546_vm1, %v607_v58, %v4589_v63  ;;  %v2740_v23 = vmul.f32 %v2605_v6, %v2710_v57  ;;  %v1276_v25 = vmul.f32 %v2612_v7, %v2699_v49  ;;  %v2746_v26 = vmul.f32 %v2612_v7, %v2710_v57  ;;  %v2775_v58 = vld [vmem:[%s2610_s29 + $0x8] sm:$0xff] }
  0x20   : > { %v1464_v30 = vadd.f32 %v1378_v48, %v1223_v1  ;;  %v683_v33 = vadd.f32 %v609_v21, %v409_v50  ;;  %v851_v34 = vsel %vm788_vm2, %v849_v14, %v4588_v15  ;;  %v1155_v36 = vrot.slane %v1035_v17, 1  ;;  %v328_v50 = vld [vmem:[%s2610_s29] sm:$0xff] }
  0x21   : > { %v4587_v37 = vrot.slane %v2740_v23, 1  ;;  %v1396_v38 = vrot.slane %v1276_v25, 2  ;;  %v4586_v39 = vrot.slane %v2746_v26, 2  ;;  %v1505_v40 = vmul.f32 %v2621_v11, %v2727_v8 }
  0x22   : > { %v1529_v44 = vadd.f32 %v1497_v35, %v1464_v30  ;;  %v925_v45 = vadd.f32 %v851_v34, %v683_v33  ;;  %v1582_v47 = vmul.f32 %v2623_v12, %v2727_v8  ;;  %v2759_v48 = vmul.f32 %v2623_v12, %v2733_v20  ;;  %v2780_v30 = vld [vmem:[%s2610_s29 + $0x18] sm:$0xff] }
  0x23   : > { %v1157_v51 = vsel %vm546_vm1, %v1155_v36, %v4587_v37  ;;  %v1398_v53 = vsel %vm788_vm2, %v1396_v38, %v4586_v39  ;;  %v1823_v35 = vmul.f32 %v2656_v27, %v2727_v8  ;;  %v2772_v56 = vmul.f32 %v2656_v27, %v2733_v20  ;;  %4738 = vst [vmem:[#allocation6_spill] sm:$0xff] %v2780_v30 }
  0x24   : > { %v1770_v59 = vadd.f32 %v1684_v61, %v1529_v44  ;;  %v990_v1 = vadd.f32 %v958_v0, %v925_v45  ;;  %v1702_v14 = vrot.slane %v1582_v47, 1  ;;  %v4584_v17 = vrot.slane %v2759_v48, 1  ;;  %v2788_v0 = vld [vmem:[%s2610_s29 + $0x20] sm:$0xff] }
  0x25   : > { %v1943_v21 = vrot.slane %v1823_v35, 2  ;;  %v4585_v25 = vrot.slane %v2772_v56, 2  ;;  %v385_v33 = vmul.f32 %v2597_v2, %v328_v50  ;;  %v450_v34 = vmul.f32 %v2599_v3, %v328_v50 }
  0x26   : > { %v2011_v36 = vadd.f32 %v1925_v62, %v1770_v59  ;;  %v1231_v38 = vadd.f32 %v1157_v51, %v990_v1  ;;  %v1704_v61 = vsel %vm546_vm1, %v1702_v14, %v4584_v17  ;;  %v2792_v44 = vmul.f32 %v2599_v3, %v2775_v58  ;;  %v2809_v17 = vld [vmem:[%s2610_s29 + $0x30] sm:$0xff] }
  0x27   : > { %v1945_v45 = vsel %vm788_vm2, %v1943_v21, %v4585_v25  ;;  %v547_v47 = vrot.slane %v450_v34, 1  ;;  %v692_v35 = vmul.f32 %v2601_v4, %v328_v50  ;;  %v2800_v62 = vmul.f32 %v2601_v4, %v2775_v58  ;;  %4739 = vst [vmem:[#allocation7_spill] sm:$0xff] %v2809_v17 }
  0x28   : > { %2422 = vmatmul.msk.f32.vlgmr.msra.gmra.mxu2 %vm2032_vm3, %v2011_v36  ;;  %v1472_v51 = vadd.f32 %v1398_v53, %v1231_v38  ;;  %v4591_v59 = vrot.slane %v2792_v44, 1  ;;  %v934_v1 = vmul.f32 %v2603_v5, %v2780_v30  ;;  %v999_v14 = vmul.f32 %v2605_v6, %v2780_v30  ;;  %v2819_v38 = vld [vmem:[%s2610_s29 + $0x38] sm:$0xff] }
  0x29   : > { %v789_v21 = vrot.slane %v692_v35, 2  ;;  %v4592_v50 = vrot.slane %v2800_v62, 2  ;;  %v2814_v34 = vmul.f32 %v2605_v6, %v2788_v0  ;;  %v1240_v53 = vmul.f32 %v2612_v7, %v2780_v30  ;;  %v2884_v30 = vld [vmem:[%s2610_s29 + $0x90] sm:$0xff] }
  0x2a   : > { %v1537_v36 = vadd.f32 %v1505_v40, %v1472_v51  ;;  %v549_v25 = vsel %vm546_vm1, %v547_v47, %v4591_v59  ;;  %v1095_v39 = vrot.slane %v999_v14, 1  ;;  %v2826_v35 = vmul.f32 %v2612_v7, %v2788_v0  ;;  %4743 = vst [vmem:[#allocation11_spill] sm:$0xff] %v2884_v30 }
  0x2b   : > { %v659_v37 = vadd.f32 %v549_v25, %v385_v33  ;;  %v791_v15 = vsel %vm788_vm2, %v789_v21, %v4592_v50  ;;  %v4598_v40 = vrot.slane %v2814_v34, 1  ;;  %v1336_v51 = vrot.slane %v1240_v53, 2  ;;  %v340_v21 = vld [vmem:[%s2610_s29 + $0x60] sm:$0xff] }
  0x2c   : > { %v1778_v63 = vadd.f32 %v1704_v61, %v1537_v36  ;;  %v4597_v54 = vrot.slane %v2826_v35, 2  ;;  %v1546_v47 = vmul.f32 %v2623_v12, %v2809_v17  ;;  %v1481_v59 = vmul.f32 %v2621_v11, %v2809_v17  ;;  %v2845_v61 = vld [vmem:[%s2610_s29 + $0x68] sm:$0xff] }
  0x2d   : > { %v901_v14 = vadd.f32 %v791_v15, %v659_v37  ;;  %v2839_v25 = vmul.f32 %v2623_v12, %v2819_v38  ;;  %v1787_v33 = vmul.f32 %v2656_v27, %v2809_v17  ;;  %v1097_v36 = vsel %vm546_vm1, %v1095_v39, %v4598_v40  ;;  %v2864_v39 = vld [vmem:[%s2610_s29 + $0x80] sm:$0xff] }
  0x2e   : > { %v2019_v53 = vadd.f32 %v1945_v45, %v1778_v63  ;;  %v1642_v15 = vrot.slane %v1546_v47, 1  ;;  %v2852_v37 = vmul.f32 %v2656_v27, %v2819_v38  ;;  %v1338_v52 = vsel %vm788_vm2, %v1336_v51, %v4597_v54  ;;  %4741 = vst [vmem:[#allocation9_spill] sm:$0xff] %v2864_v39 }
  0x2f   : > { %v966_v50 = vadd.f32 %v934_v1, %v901_v14  ;;  %v4604_v41 = vrot.slane %v2839_v25, 1  ;;  %v1883_v31 = vrot.slane %v1787_v33, 2  ;;  %v462_v45 = vmul.f32 %v2599_v3, %v340_v21 }
  0x30   : > { %2430 = vmatmul.msk.f32.vlgmr.msra.gmra.mxu3 %vm2032_vm3, %v2019_v53  ;;  %v2869_v1 = vmul.f32 %v2599_v3, %v2845_v61  ;;  %v704_v51 = vmul.f32 %v2601_v4, %v340_v21  ;;  %v393_v33 = vmul.f32 %v2597_v2, %v340_v21  ;;  %v2878_v53 = vmul.f32 %v2601_v4, %v2845_v61 }
  0x31   : > { %v1207_v47 = vadd.f32 %v1097_v36, %v966_v50  ;;  %v1644_v14 = vsel %vm546_vm1, %v1642_v15, %v4604_v41  ;;  %v567_v54 = vrot.slane %v462_v45, 1  ;;  %v942_v63 = vmul.f32 %v2603_v5, %v2859_v29 }
  0x32   : > { %4742 = vst [vmem:[#allocation10_spill] sm:$0xff] %v2869_v1  ;;  %v4613_v40 = vrot.slane %v2869_v1, 1  ;;  %v809_v24 = vrot.slane %v704_v51, 2  ;;  %v1011_v36 = vmul.f32 %v2605_v6, %v2859_v29  ;;  %v2891_v21 = vmul.f32 %v2605_v6, %v2864_v39  ;;  %v2897_v51 = vld [vmem:[%s2610_s29 + $0x98] sm:$0xff] }
  0x33   : > { %v1448_v17 = vadd.f32 %v1338_v52, %v1207_v47  ;;  %v4745_v15 = vrot.slane %v2852_v37, 2  ;;  %4746 = vst [vmem:[#allocation13_spill] sm:$0xff] %v2897_v51  ;;  %v1252_v47 = vmul.f32 %v2612_v7, %v2859_v29  ;;  %v2906_v41 = vmul.f32 %v2612_v7, %v2864_v39 }
  0x34   : > { %4744 = vst [vmem:[#allocation12_spill] sm:$0xff] %v2891_v21  ;;  %v569_v52 = vsel %vm546_vm1, %v567_v54, %v4613_v40  ;;  %v4747_v49 = vrot.slane %v2878_v53, 2  ;;  %v4618_v18 = vrot.slane %v2891_v21, 1  ;;  %v1558_v40 = vmul.f32 %v2623_v12, %v2884_v30 }
  0x35   : > { %v1885_v45 = vsel %vm788_vm2, %v1883_v31, %v4745_v15  ;;  %v1513_v50 = vadd.f32 %v1481_v59, %v1448_v17  ;;  %v667_v8 = vadd.f32 %v569_v52, %v393_v33  ;;  %v1115_v15 = vrot.slane %v1011_v36, 1 }
  0x36   : > { %v811_v31 = vsel %vm788_vm2, %v809_v24, %v4747_v49  ;;  %v1356_v10 = vrot.slane %v1252_v47, 2  ;;  %v4621_v54 = vrot.slane %v2906_v41, 2  ;;  %v2917_v17 = vmul.f32 %v2623_v12, %v2897_v51  ;;  %v354_v24 = vld [vmem:[%s2610_s29 + $0xd0] sm:$0x3] }
  0x37   : > { %v1754_v29 = vadd.f32 %v1644_v14, %v1513_v50  ;;  %v909_v1 = vadd.f32 %v811_v31, %v667_v8  ;;  %v1799_v59 = vmul.f32 %v2656_v27, %v2884_v30  ;;  %v1117_v49 = vsel %vm546_vm1, %v1115_v15, %v4618_v18  ;;  %v2932_v8 = vld [vmem:[%s2610_s29 + $0xe8] sm:$0x3]  ;;  %v2940_v18 = vld [vmem:[%s2610_s29 + $0x100] sm:$0x3] }
  0x38   : > { %4748 = vst [vmem:[#allocation14_spill] sm:$0xff] %v2917_v17  ;;  %v1489_v33 = vmul.f32 %v2621_v11, %v2884_v30  ;;  %v1662_v36 = vrot.slane %v1558_v40, 1  ;;  %v2929_v14 = vmul.f32 %v2656_v27, %v2897_v51  ;;  %v4622_v47 = vrot.slane %v2917_v17, 1 }
  0x39   : > { %4750 = vst [vmem:[#allocation16_spill] sm:$0xff] %v2932_v8  ;;  %v1995_v50 = vadd.f32 %v1885_v45, %v1754_v29  ;;  %v974_v52 = vadd.f32 %v942_v63, %v909_v1  ;;  %v1903_v31 = vrot.slane %v1799_v59, 2  ;;  %v1358_v21 = vsel %vm788_vm2, %v1356_v10, %v4621_v54 }
  0x3a   : > { %4749 = vst [vmem:[#allocation15_spill] sm:$0xff] %v2929_v14  ;;  %v4626_v15 = vrot.slane %v2929_v14, 2  ;;  %v476_v40 = vmul.f32 %v2599_v3, %v354_v24  ;;  %v718_v30 = vmul.f32 %v2601_v4, %v354_v24  ;;  %v1664_v63 = vsel %vm546_vm1, %v1662_v36, %v4622_v47  ;;  %v2973_v14 = vld [vmem:[%s2610_s29 + $0x148] sm:$0x3] }
  0x3b   : > { %2406 = vmatmul.msk.f32.vlgmr.msra.gmra.mxu0 %vm2032_vm3, %v1995_v50  ;;  %v1215_v29 = vadd.f32 %v1117_v49, %v974_v52  ;;  %v402_v1 = vmul.f32 %v2597_v2, %v2616_v9  ;;  %v1025_v10 = vmul.f32 %v2605_v6, %v2932_v8  ;;  %v951_v54 = vmul.f32 %v2603_v5, %v2626_v13  ;;  %v366_v52 = vld [vmem:[%s2610_s29 + $0x130] sm:$0x3] }
  0x3c   : > { %v590_v45 = vrot.slane %v476_v40, 1  ;;  %v832_v59 = vrot.slane %v718_v30, 2  ;;  %v1266_v24 = vmul.f32 %v2612_v7, %v2932_v8  ;;  %v1905_v36 = vsel %vm788_vm2, %v1903_v31, %v4626_v15 }
  0x3d   : > { %v1456_v49 = vadd.f32 %v1358_v21, %v1215_v29  ;;  %v1138_v50 = vrot.slane %v1025_v10, 1  ;;  %v1572_v9 = vmul.f32 %v2623_v12, %v2940_v18  ;;  %v4751_v40 = vrot.slane %v2632_v16, 1 }
  0x3e   : > { %v4752_v47 = vrot.slane %v2640_v19, 2  ;;  %v1379_v8 = vrot.slane %v1266_v24, 2  ;;  %v1813_v21 = vmul.f32 %v2656_v27, %v2940_v18  ;;  %v1498_v10 = vmul.f32 %v2621_v11, %v2659_v28 }
  0x3f   : > { %v591_v30 = vsel %vm546_vm1, %v4751_v40, %v590_v45  ;;  %v1521_v29 = vadd.f32 %v1489_v33, %v1456_v49  ;;  %v1685_v15 = vrot.slane %v1572_v9, 1  ;;  %v4753_v16 = vrot.slane %v2648_v22, 1 }
  0x40   : > { %v833_v17 = vsel %vm788_vm2, %v4752_v47, %v832_v59  ;;  %v676_v31 = vadd.f32 %v591_v30, %v402_v1  ;;  %v4754_v19 = vrot.slane %v2665_v32, 2  ;;  %v1926_v59 = vrot.slane %v1813_v21, 2  ;;  %v2983_v1 = vld [vmem:[%s2610_s29 + $0x160] sm:$0x3] }
  0x41   : > { %v1139_v45 = vsel %vm546_vm1, %v4753_v16, %v1138_v50  ;;  %v488_v24 = vmul.f32 %v2599_v3, %v366_v52  ;;  %v1762_v40 = vadd.f32 %v1664_v63, %v1521_v29  ;;  %v410_v49 = vmul.f32 %v2597_v2, %v2683_v42  ;;  %v330_v16 = vld [vmem:[%s2610_s29 + $0x10] sm:$0x3] }
  0x42   : > { %v1380_v47 = vsel %vm788_vm2, %v4754_v19, %v1379_v8  ;;  %v918_v33 = vadd.f32 %v833_v17, %v676_v31  ;;  %v730_v9 = vmul.f32 %v2601_v4, %v366_v52  ;;  %v4755_v22 = vrot.slane %v2687_v43, 1 }
  0x43   : > { %v4756_v32 = vrot.slane %v2693_v46, 2  ;;  %v610_v30 = vrot.slane %v488_v24, 1  ;;  %v1037_v17 = vmul.f32 %v2605_v6, %v2973_v14  ;;  %v2003_v63 = vadd.f32 %v1905_v36, %v1762_v40 }
  0x44   : > { %v1686_v50 = vsel %vm546_vm1, %v4755_v22, %v1685_v15  ;;  %v983_v21 = vadd.f32 %v951_v54, %v918_v33  ;;  %v852_v29 = vrot.slane %v730_v9, 2  ;;  %v1278_v42 = vmul.f32 %v2612_v7, %v2973_v14 }
  0x45   : > { %v1927_v8 = vsel %vm788_vm2, %v4756_v32, %v1926_v59  ;;  %v4757_v52 = vrot.slane %v2707_v55, 1  ;;  %v959_v46 = vmul.f32 %v2603_v5, %v2710_v57  ;;  %v1158_v15 = vrot.slane %v1037_v17, 1  ;;  %2414 = vmatmul.msk.f32.vlgmr.msra.gmra.mxu1 %vm2032_vm3, %v2003_v63  ;;  %v3018_v32 = vld [vmem:[%s2610_s29 + $0x28] sm:$0x3] }
  0x46   : > { %v1584_v31 = vmul.f32 %v2623_v12, %v2983_v1  ;;  %v1224_v54 = vadd.f32 %v1139_v45, %v983_v21  ;;  %v4758_v19 = vrot.slane %v2715_v60, 2  ;;  %v1399_v24 = vrot.slane %v1278_v42, 2 }
  0x47   : > { %v611_v43 = vsel %vm546_vm1, %v4757_v52, %v610_v30  ;;  %v4759_v55 = vrot.slane %v2740_v23, 1  ;;  %v1506_v33 = vmul.f32 %v2621_v11, %v2733_v20  ;;  %v1825_v22 = vmul.f32 %v2656_v27, %v2983_v1 }
  0x48   : > { %v684_v36 = vadd.f32 %v611_v43, %v410_v49  ;;  %v853_v59 = vsel %vm788_vm2, %v4758_v19, %v852_v29  ;;  %v1705_v9 = vrot.slane %v1584_v31, 1  ;;  %v1465_v45 = vadd.f32 %v1380_v47, %v1224_v54  ;;  %v3031_v47 = vld [vmem:[%s2610_s29 + $0x40] sm:$0x3] }
  0x49   : > { %v1159_v40 = vsel %vm546_vm1, %v4759_v55, %v1158_v15  ;;  %v386_v60 = vmul.f32 %v2597_v2, %v2775_v58  ;;  %v452_v30 = vmul.f32 %v2599_v3, %v330_v16  ;;  %v4760_v23 = vrot.slane %v2746_v26, 2 }
  0x4a   : > { %v926_v49 = vadd.f32 %v853_v59, %v684_v36  ;;  %v4761_v63 = vrot.slane %v2759_v48, 1  ;;  %v1946_v29 = vrot.slane %v1825_v22, 2  ;;  %v694_v42 = vmul.f32 %v2601_v4, %v330_v16 }
  0x4b   : > { %v1400_v17 = vsel %vm788_vm2, %v4760_v23, %v1399_v24  ;;  %v1530_v52 = vadd.f32 %v1498_v10, %v1465_v45  ;;  %v550_v15 = vrot.slane %v452_v30, 1  ;;  %v1001_v58 = vmul.f32 %v2605_v6, %v3018_v32  ;;  %v342_v45 = vld [vmem:[%s2610_s29 + $0x70] sm:$0x3] }
  0x4c   : > { %v1706_v21 = vsel %vm546_vm1, %v4761_v63, %v1705_v9  ;;  %v991_v43 = vadd.f32 %v959_v46, %v926_v49  ;;  %v4762_v26 = vrot.slane %v2772_v56, 2  ;;  %v792_v54 = vrot.slane %v694_v42, 2 }
  0x4d   : > { %v935_v48 = vmul.f32 %v2603_v5, %v2788_v0  ;;  %v1242_v10 = vmul.f32 %v2612_v7, %v3018_v32  ;;  %v1771_v46 = vadd.f32 %v1686_v50, %v1530_v52  ;;  %v4763_v36 = vrot.slane %v2792_v44, 1 }
  0x4e   : > { %v1947_v31 = vsel %vm788_vm2, %v4762_v26, %v1946_v29  ;;  %v1232_v16 = vadd.f32 %v1159_v40, %v991_v43  ;;  %v1098_v59 = vrot.slane %v1001_v58, 1  ;;  %v4764_v56 = vrot.slane %v2800_v62, 2  ;;  %v3056_v40 = vld [vmem:[%s2610_s29 + $0x88] sm:$0x3]  ;;  %v3071_v26 = vld [vmem:[%s2610_s29 + $0xa0] sm:$0x3] }
  0x4f   : > { %v551_v19 = vsel %vm546_vm1, %v4763_v36, %v550_v15  ;;  %v1339_v9 = vrot.slane %v1242_v10, 2  ;;  %v1548_v22 = vmul.f32 %v2623_v12, %v3031_v47  ;;  %v2012_v49 = vadd.f32 %v1927_v8, %v1771_v46  ;;  %4765 = vst [vmem:[#allocation17_spill] sm:$0xff] %v3056_v40 }
  0x50   : > { %v660_v24 = vadd.f32 %v551_v19, %v386_v60  ;;  %v793_v55 = vsel %vm788_vm2, %v4764_v56, %v792_v54  ;;  %v1473_v30 = vadd.f32 %v1400_v17, %v1232_v16  ;;  %v1482_v50 = vmul.f32 %v2621_v11, %v2819_v38  ;;  %4769 = vst [vmem:[#allocation18_spill] sm:$0xff] %v3071_v26 }
  0x51   : > { %v1789_v44 = vmul.f32 %v2656_v27, %v3031_v47  ;;  %v4766_v62 = vrot.slane %v2814_v34, 1  ;;  %v4767_v63 = vrot.slane %v2826_v35, 2  ;;  %v1645_v8 = vrot.slane %v1548_v22, 1  ;;  %2423 = vmatmul.msk.f32.gmra.mxu2 %vm2032_vm3, %v2012_v49 }
  0x52   : > { %v902_v60 = vadd.f32 %v793_v55, %v660_v24  ;;  %v1538_v17 = vadd.f32 %v1506_v33, %v1473_v30  ;;  %v464_v52 = vmul.f32 %v2599_v3, %v342_v45  ;;  %v706_v43 = vmul.f32 %v2601_v4, %v342_v45 }
  0x53   : > { %v1099_v23 = vsel %vm546_vm1, %v4766_v62, %v1098_v59  ;;  %v1340_v29 = vsel %vm788_vm2, %v4767_v63, %v1339_v9  ;;  %v1886_v42 = vrot.slane %v1789_v44, 2  ;;  %v4768_v58 = vrot.slane %v2839_v25, 1 }
  0x54   : > { %v967_v15 = vadd.f32 %v935_v48, %v902_v60  ;;  %v394_v35 = vmul.f32 %v2597_v2, %v2845_v61  ;;  %v1013_v54 = vmul.f32 %v2605_v6, %v3056_v40  ;;  %v1779_v10 = vadd.f32 %v1706_v21, %v1538_v17  ;;  %v4771_v61 = vld [vmem:[#allocation10_spill] sm:$0xff] }
  0x55   : > { %v1646_v34 = vsel %vm546_vm1, %v4768_v58, %v1645_v8  ;;  %v570_v33 = vrot.slane %v464_v52, 1  ;;  %v812_v46 = vrot.slane %v706_v43, 2  ;;  %v943_v16 = vmul.f32 %v2603_v5, %v2864_v39 }
  0x56   : > { %v1208_v36 = vadd.f32 %v1099_v23, %v967_v15  ;;  %v4770_v48 = vrot.slane %v2852_v37, 2  ;;  %v1118_v19 = vrot.slane %v1013_v54, 1  ;;  %v1254_v59 = vmul.f32 %v2612_v7, %v3056_v40  ;;  %v4776_v23 = vld [vmem:[#allocation2_spill] sm:$0xff] }
  0x57   : > { %v2020_v24 = vadd.f32 %v1947_v31, %v1779_v10  ;;  %v4772_v56 = vrot.slane %v4771_v61, 1  ;;  %v4773_v21 = vrot.slane %v2878_v53, 2  ;;  %v1560_v22 = vmul.f32 %v2623_v12, %v3071_v26  ;;  %v4774_v31 = vld [vmem:[#allocation12_spill] sm:$0xff] }
  0x58   : > { %v1887_v25 = vsel %vm788_vm2, %v4770_v48, %v1886_v42  ;;  %v1449_v45 = vadd.f32 %v1340_v29, %v1208_v36  ;;  %v1359_v49 = vrot.slane %v1254_v59, 2  ;;  %v1490_v30 = vmul.f32 %v2621_v11, %v2897_v51 }
  0x59   : > { %v571_v55 = vsel %vm546_vm1, %v4772_v56, %v570_v33  ;;  %v813_v9 = vsel %vm788_vm2, %v4773_v21, %v812_v46  ;;  %2431 = vmatmul.msk.f32.gmra.mxu3 %vm2032_vm3, %v2020_v24  ;;  %v4775_v44 = vrot.slane %v4774_v31, 1  ;;  %v1665_v62 = vrot.slane %v1560_v22, 1  ;;  %v4778_v46 = vld [vmem:[#allocation14_spill] sm:$0xff]  ;;  %v3133_v21 = vld [vmem:[%s2610_s29 + $0x110] sm:$0xff] }
  0x5a   : > { %v668_v37 = vadd.f32 %v571_v55, %v394_v35  ;;  %v1801_v53 = vmul.f32 %v2656_v27, %v3071_v26  ;;  %v477_v63 = vmul.f32 %v2599_v3, %v4776_v23  ;;  %v1514_v8 = vadd.f32 %v1482_v50, %v1449_v45 }
  0x5b   : > { %v1119_v60 = vsel %vm546_vm1, %v4775_v44, %v1118_v19  ;;  %v403_v17 = vmul.f32 %v2597_v2, %v4776_v23  ;;  %v3106_v42 = vmul.f32 %v2599_v3, %v2626_v13  ;;  %v4777_v52 = vrot.slane %v2906_v41, 2  ;;  %v4780_v19 = vld [vmem:[#allocation3_spill] sm:$0xff] }
  0x5c   : > { %v910_v29 = vadd.f32 %v813_v9, %v668_v37  ;;  %v1906_v15 = vrot.slane %v1801_v53, 2  ;;  %v592_v58 = vrot.slane %v477_v63, 1  ;;  %v719_v35 = vmul.f32 %v2601_v4, %v4776_v23 }
  0x5d   : > { %v1360_v43 = vsel %vm788_vm2, %v4777_v52, %v1359_v49  ;;  %v1755_v50 = vadd.f32 %v1646_v34, %v1514_v8  ;;  %v4638_v10 = vrot.slane %v3106_v42, 1  ;;  %v3116_v33 = vmul.f32 %v2601_v4, %v2626_v13  ;;  %v4782_v49 = vld [vmem:[#allocation15_spill] sm:$0xff] }
  0x5e   : > { %v975_v54 = vadd.f32 %v943_v16, %v910_v29  ;;  %v4779_v36 = vrot.slane %v4778_v46, 1  ;;  %v834_v48 = vrot.slane %v719_v35, 2  ;;  %v952_v59 = vmul.f32 %v2603_v5, %v4780_v19  ;;  %v3126_v16 = vld [vmem:[%s2610_s29 + $0x108] sm:$0xff] }
  0x5f   : > { %v1026_v24 = vmul.f32 %v2605_v6, %v4780_v19  ;;  %v1996_v61 = vadd.f32 %v1887_v25, %v1755_v50  ;;  %4781 = vst [vmem:[#allocation10_spill] sm:$0xff] %v3126_v16  ;;  %v594_v56 = vsel %vm546_vm1, %v592_v58, %v4638_v10  ;;  %v4637_v55 = vrot.slane %v3116_v33, 2 }
  0x60   : > { %v1666_v41 = vsel %vm546_vm1, %v4779_v36, %v1665_v62  ;;  %v1216_v34 = vadd.f32 %v1119_v60, %v975_v54  ;;  %v677_v9 = vadd.f32 %v594_v56, %v403_v17  ;;  %v3137_v22 = vmul.f32 %v2605_v6, %v2659_v28 }
  0x61   : > { %v1140_v45 = vrot.slane %v1026_v24, 1  ;;  %v1267_v25 = vmul.f32 %v2612_v7, %v4780_v19  ;;  %2407 = vmatmul.msk.f32.gmra.mxu0 %vm2032_vm3, %v1996_v61  ;;  %v4783_v31 = vrot.slane %v4782_v49, 2  ;;  %v836_v60 = vsel %vm788_vm2, %v834_v48, %v4637_v55  ;;  %v4784_v24 = vld [vmem:[#allocation4_spill] sm:$0xff] }
  0x62   : > { %v1457_v37 = vadd.f32 %v1360_v43, %v1216_v34  ;;  %v3150_v62 = vmul.f32 %v2612_v7, %v2659_v28  ;;  %v919_v53 = vadd.f32 %v836_v60, %v677_v9  ;;  %v4635_v23 = vrot.slane %v3137_v22, 1 }
  0x63   : > { %v1907_v44 = vsel %vm788_vm2, %v4783_v31, %v1906_v15  ;;  %v1381_v63 = vrot.slane %v1267_v25, 2  ;;  %v1573_v8 = vmul.f32 %v2623_v12, %v3126_v16  ;;  %v3158_v52 = vmul.f32 %v2623_v12, %v3133_v21 }
  0x64   : > { %v1522_v29 = vadd.f32 %v1490_v30, %v1457_v37  ;;  %v4634_v17 = vrot.slane %v3150_v62, 2  ;;  %v1814_v43 = vmul.f32 %v2656_v27, %v3126_v16  ;;  %v984_v15 = vadd.f32 %v952_v59, %v919_v53  ;;  %v4785_v53 = vld [vmem:[#allocation5_spill] sm:$0xff] }
  0x65   : > { %v1142_v58 = vsel %vm546_vm1, %v1140_v45, %v4635_v23  ;;  %v1687_v35 = vrot.slane %v1573_v8, 1  ;;  %v3167_v50 = vmul.f32 %v2656_v27, %v3133_v21  ;;  %v4633_v46 = vrot.slane %v3158_v52, 1 }
  0x66   : > { %v1763_v30 = vadd.f32 %v1666_v41, %v1522_v29  ;;  %v1383_v54 = vsel %vm788_vm2, %v1381_v63, %v4634_v17  ;;  %v1928_v36 = vrot.slane %v1814_v43, 2  ;;  %v1225_v48 = vadd.f32 %v1142_v58, %v984_v15  ;;  %v3201_v29 = vld [vmem:[%s2610_s29 + $0x168] sm:$0xff]  ;;  %v3204_v43 = vld [vmem:[%s2610_s29 + $0x170] sm:$0xff] }
  0x67   : > { %v1499_v19 = vmul.f32 %v2621_v11, %v3126_v16  ;;  %v4632_v59 = vrot.slane %v3167_v50, 2  ;;  %v489_v61 = vmul.f32 %v2599_v3, %v4784_v24  ;;  %v411_v41 = vmul.f32 %v2597_v2, %v4784_v24  ;;  %4786 = vst [vmem:[#allocation12_spill] sm:$0xff] %v3201_v29 }
  0x68   : > { %v2004_v34 = vadd.f32 %v1907_v44, %v1763_v30  ;;  %v3182_v56 = vmul.f32 %v2599_v3, %v2710_v57  ;;  %v731_v9 = vmul.f32 %v2601_v4, %v4784_v24  ;;  %v1466_v45 = vadd.f32 %v1383_v54, %v1225_v48 }
  0x69   : > { %v1689_v25 = vsel %vm546_vm1, %v1687_v35, %v4633_v46  ;;  %v612_v37 = vrot.slane %v489_v61, 1  ;;  %v3191_v49 = vmul.f32 %v2601_v4, %v2710_v57  ;;  %v1930_v31 = vsel %vm788_vm2, %v1928_v36, %v4632_v59  ;;  %v4788_v46 = vld [vmem:[#allocation7_spill] sm:$0xff] }
  0x6a   : > { %2415 = vmatmul.msk.f32.gmra.mxu1 %vm2032_vm3, %v2004_v34  ;;  %v4628_v44 = vrot.slane %v3182_v56, 1  ;;  %v854_v60 = vrot.slane %v731_v9, 2  ;;  %v1038_v63 = vmul.f32 %v2605_v6, %v4785_v53  ;;  %v1531_v8 = vadd.f32 %v1499_v19, %v1466_v45 }
  0x6b   : > { %v4630_v15 = vrot.slane %v3191_v49, 2  ;;  %v3209_v58 = vmul.f32 %v2605_v6, %v2733_v20  ;;  %v1279_v35 = vmul.f32 %v2612_v7, %v4785_v53  ;;  %v960_v54 = vmul.f32 %v2603_v5, %v4785_v53 }
  0x6c   : > { %v614_v30 = vsel %vm546_vm1, %v612_v37, %v4628_v44  ;;  %v1160_v36 = vrot.slane %v1038_v63, 1  ;;  %v3220_v48 = vmul.f32 %v2612_v7, %v2733_v20  ;;  %v1772_v19 = vadd.f32 %v1689_v25, %v1531_v8 }
  0x6d   : > { %v685_v24 = vadd.f32 %v614_v30, %v411_v41  ;;  %v856_v61 = vsel %vm788_vm2, %v854_v60, %v4630_v15  ;;  %v4629_v34 = vrot.slane %v3209_v58, 1  ;;  %v1401_v9 = vrot.slane %v1279_v35, 2 }
  0x6e   : > { %v4631_v45 = vrot.slane %v3220_v48, 2  ;;  %v1585_v37 = vmul.f32 %v2623_v12, %v3201_v29  ;;  %v3231_v53 = vmul.f32 %v2623_v12, %v3204_v43  ;;  %v2013_v63 = vadd.f32 %v1930_v31, %v1772_v19 }
  0x6f   : > { %v927_v44 = vadd.f32 %v856_v61, %v685_v24  ;;  %v1507_v41 = vmul.f32 %v2621_v11, %v3201_v29  ;;  %v1826_v25 = vmul.f32 %v2656_v27, %v3201_v29  ;;  %v1162_v60 = vsel %vm546_vm1, %v1160_v36, %v4629_v34  ;;  %v4787_v61 = vld [vmem:[#allocation6_spill] sm:$0xff] }
  0x70   : > { %v1707_v8 = vrot.slane %v1585_v37, 1  ;;  %v4636_v35 = vrot.slane %v3231_v53, 1  ;;  %v3243_v30 = vmul.f32 %v2656_v27, %v3204_v43  ;;  %2424 = vmatmul.msk.f32.gmra.mxu2 %vm2032_vm3, %v2013_v63  ;;  %v1403_v19 = vsel %vm788_vm2, %v1401_v9, %v4631_v45 }
  0x71   : > { %v992_v31 = vadd.f32 %v960_v54, %v927_v44  ;;  %v1948_v24 = vrot.slane %v1826_v25, 2  ;;  %v453_v36 = vmul.f32 %v2599_v3, %v4787_v61  ;;  %v387_v34 = vmul.f32 %v2597_v2, %v4787_v61 }
  0x72   : > { %v4645_v37 = vrot.slane %v3243_v30, 2  ;;  %v3256_v15 = vmul.f32 %v2599_v3, %v2788_v0  ;;  %v695_v44 = vmul.f32 %v2601_v4, %v4787_v61  ;;  %v1709_v9 = vsel %vm546_vm1, %v1707_v8, %v4636_v35 }
  0x73   : > { %v1233_v54 = vadd.f32 %v1162_v60, %v992_v31  ;;  %v552_v63 = vrot.slane %v453_v36, 1  ;;  %v3265_v25 = vmul.f32 %v2601_v4, %v2788_v0  ;;  %v936_v17 = vmul.f32 %v2603_v5, %v4788_v46  ;;  %v3273_v60 = vld [vmem:[%s2610_s29 + $0x48] sm:$0xff]  ;;  %v3276_v31 = vld [vmem:[%s2610_s29 + $0x50] sm:$0xff] }
  0x74   : > { %v4646_v45 = vrot.slane %v3256_v15, 1  ;;  %v794_v59 = vrot.slane %v695_v44, 2  ;;  %v1002_v23 = vmul.f32 %v2605_v6, %v4788_v46  ;;  %4789 = vst [vmem:[#allocation2_spill] sm:$0xff] %v3273_v60  ;;  %v3281_v36 = vmul.f32 %v2605_v6, %v2819_v38 }
  0x75   : > { %v1474_v61 = vadd.f32 %v1403_v19, %v1233_v54  ;;  %v1243_v44 = vmul.f32 %v2612_v7, %v4788_v46  ;;  %v1950_v35 = vsel %vm788_vm2, %v1948_v24, %v4645_v37  ;;  %v3293_v55 = vmul.f32 %v2612_v7, %v2819_v38 }
  0x76   : > { %4790 = vst [vmem:[#allocation14_spill] sm:$0xff] %v3281_v36  ;;  %v554_v19 = vsel %vm546_vm1, %v552_v63, %v4646_v45  ;;  %v1100_v54 = vrot.slane %v1002_v23, 1  ;;  %v4792_v29 = vrot.slane %v3265_v25, 2  ;;  %v4647_v46 = vrot.slane %v3281_v36, 1 }
  0x77   : > { %4791 = vst [vmem:[#allocation3_spill] sm:$0xff] %v3293_v55  ;;  %v1539_v10 = vadd.f32 %v1507_v41, %v1474_v61  ;;  %v661_v8 = vadd.f32 %v554_v19, %v387_v34  ;;  %v1341_v26 = vrot.slane %v1243_v44, 2  ;;  %v4649_v24 = vrot.slane %v3293_v55, 2 }
  0x78   : > { %v796_v16 = vsel %vm788_vm2, %v794_v59, %v4792_v29  ;;  %v1549_v37 = vmul.f32 %v2623_v12, %v3273_v60  ;;  %v3304_v23 = vmul.f32 %v2623_v12, %v3276_v31  ;;  %v1483_v34 = vmul.f32 %v2621_v11, %v3273_v60 }
  0x79   : > { %v1780_v63 = vadd.f32 %v1709_v9, %v1539_v10  ;;  %v903_v45 = vadd.f32 %v796_v16, %v661_v8  ;;  %v1790_v59 = vmul.f32 %v2656_v27, %v3273_v60  ;;  %v1102_v29 = vsel %vm546_vm1, %v1100_v54, %v4647_v46  ;;  %v4794_v54 = vld [vmem:[#allocation8_spill] sm:$0xff] }
  0x7a   : > { %4793 = vst [vmem:[#allocation15_spill] sm:$0xff] %v3304_v23  ;;  %v1647_v41 = vrot.slane %v1549_v37, 1  ;;  %v4648_v61 = vrot.slane %v3304_v23, 1  ;;  %v3316_v44 = vmul.f32 %v2656_v27, %v3276_v31  ;;  %v1343_v16 = vsel %vm788_vm2, %v1341_v26, %v4649_v24 }
  0x7b   : > { %v2021_v19 = vadd.f32 %v1950_v35, %v1780_v63  ;;  %v968_v10 = vadd.f32 %v936_v17, %v903_v45  ;;  %v1888_v9 = vrot.slane %v1790_v59, 2  ;;  %v395_v37 = vmul.f32 %v2597_v2, %v4794_v54 }
  0x7c   : > { %v1649_v8 = vsel %vm546_vm1, %v1647_v41, %v4648_v61  ;;  %v465_v46 = vmul.f32 %v2599_v3, %v4794_v54  ;;  %v3330_v17 = vmul.f32 %v2599_v3, %v2864_v39  ;;  %v707_v35 = vmul.f32 %v2601_v4, %v4794_v54  ;;  %v4796_v61 = vld [vmem:[#allocation11_spill] sm:$0xff] }
  0x7d   : > { %2432 = vmatmul.msk.f32.gmra.mxu3 %vm2032_vm3, %v2021_v19  ;;  %v1209_v26 = vadd.f32 %v1102_v29, %v968_v10  ;;  %v3338_v63 = vmul.f32 %v2601_v4, %v2864_v39  ;;  %v944_v24 = vmul.f32 %v2603_v5, %v4796_v61  ;;  %v1014_v60 = vmul.f32 %v2605_v6, %v4796_v61  ;;  %v3346_v29 = vld [vmem:[%s2610_s29 + $0xa8] sm:$0xff]  ;;  %v3354_v39 = vld [vmem:[%s2610_s29 + $0xb0] sm:$0xff] }
  0x7e   : > { %4795 = vst [vmem:[#allocation4_spill] sm:$0xff] %v3330_v17  ;;  %v572_v59 = vrot.slane %v465_v46, 1  ;;  %v4659_v41 = vrot.slane %v3330_v17, 1  ;;  %v814_v10 = vrot.slane %v707_v35, 2  ;;  %v3351_v54 = vmul.f32 %v2605_v6, %v2897_v51 }
  0x7f   : > { %v1450_v19 = vadd.f32 %v1343_v16, %v1209_v26  ;;  %4797 = vst [vmem:[#allocation5_spill] sm:$0xff] %v3346_v29  ;;  %v4661_v45 = vrot.slane %v3338_v63, 2  ;;  %v1120_v23 = vrot.slane %v1014_v60, 1  ;;  %v1255_v40 = vmul.f32 %v2612_v7, %v4796_v61 }
  0x80   : > { %4798 = vst [vmem:[#allocation6_spill] sm:$0xff] %v3354_v39  ;;  %v574_v46 = vsel %vm546_vm1, %v572_v59, %v4659_v41  ;;  %v3363_v16 = vmul.f32 %v2612_v7, %v2897_v51  ;;  %v4662_v36 = vrot.slane %v3351_v54, 1  ;;  %v4799_v17 = vrot.slane %v3316_v44, 2 }
  0x81   : > { %v1515_v26 = vadd.f32 %v1483_v34, %v1450_v19  ;;  %v669_v35 = vadd.f32 %v574_v46, %v395_v37  ;;  %v816_v55 = vsel %vm788_vm2, %v814_v10, %v4661_v45  ;;  %v1361_v60 = vrot.slane %v1255_v40, 2 }
  0x82   : > { %v1890_v59 = vsel %vm788_vm2, %v1888_v9, %v4799_v17  ;;  %v4665_v41 = vrot.slane %v3363_v16, 2  ;;  %v1561_v61 = vmul.f32 %v2623_v12, %v3346_v29  ;;  %v1491_v37 = vmul.f32 %v2621_v11, %v3346_v29 }
  0x83   : > { %v1756_v51 = vadd.f32 %v1649_v8, %v1515_v26  ;;  %v911_v34 = vadd.f32 %v816_v55, %v669_v35  ;;  %v3379_v19 = vmul.f32 %v2623_v12, %v3354_v39  ;;  %v1122_v9 = vsel %vm546_vm1, %v1120_v23, %v4662_v36  ;;  %v3396_v23 = vld [vmem:[%s2610_s29 + $0x118] sm:$0x3] }
  0x84   : > { %v1667_v40 = vrot.slane %v1561_v61, 1  ;;  %v1802_v17 = vmul.f32 %v2656_v27, %v3346_v29  ;;  %v3388_v10 = vmul.f32 %v2656_v27, %v3354_v39  ;;  %v1363_v46 = vsel %vm788_vm2, %v1361_v60, %v4665_v41  ;;  %v4800_v61 = vld [vmem:[#allocation16_spill] sm:$0xff] }
  0x85   : > { %v1997_v55 = vadd.f32 %v1890_v59, %v1756_v51  ;;  %v976_v8 = vadd.f32 %v944_v24, %v911_v34  ;;  %v4666_v26 = vrot.slane %v3379_v19, 1  ;;  %v479_v36 = vmul.f32 %v2599_v3, %v4800_v61 }
  0x86   : > { %v1908_v35 = vrot.slane %v1802_v17, 2  ;;  %v4667_v45 = vrot.slane %v3388_v10, 2  ;;  %v721_v29 = vmul.f32 %v2601_v4, %v4800_v61  ;;  %v404_v59 = vmul.f32 %v2597_v2, %v2626_v13 }
  0x87   : > { %2408 = vmatmul.msk.f32.gmra.mxu0 %vm2032_vm3, %v1997_v55  ;;  %v1217_v51 = vadd.f32 %v1122_v9, %v976_v8  ;;  %v1669_v24 = vsel %vm546_vm1, %v1667_v40, %v4666_v26  ;;  %v1028_v60 = vmul.f32 %v2605_v6, %v2940_v18  ;;  %v595_v34 = vrot.slane %v479_v36, 1 }
  0x88   : > { %v837_v17 = vrot.slane %v721_v29, 2  ;;  %v953_v41 = vmul.f32 %v2603_v5, %v2659_v28  ;;  %v1269_v61 = vmul.f32 %v2612_v7, %v2940_v18  ;;  %v1910_v9 = vsel %vm788_vm2, %v1908_v35, %v4667_v45 }
  0x89   : > { %v1458_v55 = vadd.f32 %v1363_v46, %v1217_v51  ;;  %v1143_v40 = vrot.slane %v1028_v60, 1  ;;  %v1575_v13 = vmul.f32 %v2623_v12, %v3396_v23  ;;  %v4801_v8 = vrot.slane %v3106_v42, 1 }
  0x8a   : > { %v4802_v29 = vrot.slane %v3116_v33, 2  ;;  %v1384_v26 = vrot.slane %v1269_v61, 2  ;;  %v1816_v18 = vmul.f32 %v2656_v27, %v3396_v23  ;;  %v1500_v35 = vmul.f32 %v2621_v11, %v3133_v21 }
  0x8b   : > { %v596_v36 = vsel %vm546_vm1, %v4801_v8, %v595_v34  ;;  %v1523_v46 = vadd.f32 %v1491_v37, %v1458_v55  ;;  %v1690_v60 = vrot.slane %v1575_v13, 1  ;;  %v4803_v45 = vrot.slane %v3137_v22, 1  ;;  %v3438_v37 = vld [vmem:[%s2610_s29 + $0x178] sm:$0x3] }
  0x8c   : > { %v838_v28 = vsel %vm788_vm2, %v4802_v29, %v837_v17  ;;  %v678_v51 = vadd.f32 %v596_v36, %v404_v59  ;;  %v4804_v34 = vrot.slane %v3150_v62, 2  ;;  %v1931_v8 = vrot.slane %v1816_v18, 2 }
  0x8d   : > { %v1144_v42 = vsel %vm546_vm1, %v4803_v45, %v1143_v40  ;;  %v491_v17 = vmul.f32 %v2599_v3, %v2973_v14  ;;  %v1764_v61 = vadd.f32 %v1669_v24, %v1523_v46  ;;  %v412_v59 = vmul.f32 %v2597_v2, %v2710_v57 }
  0x8e   : > { %v1385_v33 = vsel %vm788_vm2, %v4804_v34, %v1384_v26  ;;  %v920_v27 = vadd.f32 %v838_v28, %v678_v51  ;;  %v733_v22 = vmul.f32 %v2601_v4, %v2973_v14  ;;  %v4805_v45 = vrot.slane %v3158_v52, 1 }
  0x8f   : > { %v4806_v26 = vrot.slane %v3167_v50, 2  ;;  %v615_v40 = vrot.slane %v491_v17, 1  ;;  %v1040_v24 = vmul.f32 %v2605_v6, %v2983_v1  ;;  %v2005_v13 = vadd.f32 %v1910_v9, %v1764_v61 }
  0x90   : > { %v1691_v62 = vsel %vm546_vm1, %v4805_v45, %v1690_v60  ;;  %v985_v36 = vadd.f32 %v953_v41, %v920_v27  ;;  %v857_v29 = vrot.slane %v733_v22, 2  ;;  %v1281_v57 = vmul.f32 %v2612_v7, %v2983_v1 }
  0x91   : > { %v1932_v55 = vsel %vm788_vm2, %v4806_v26, %v1931_v8  ;;  %v4807_v14 = vrot.slane %v3182_v56, 1  ;;  %v961_v28 = vmul.f32 %v2603_v5, %v2733_v20  ;;  %v1163_v50 = vrot.slane %v1040_v24, 1  ;;  %2416 = vmatmul.msk.f32.gmra.mxu1 %vm2032_vm3, %v2005_v13  ;;  %v3473_v8 = vld [vmem:[%s4580_s2 + $0x8] ss:$0 sm:$0xff]  ;;  %v3490_v13 = vld [vmem:[%s2610_s29 + $0x58] sm:$0x3] }
  0x92   : > { %v1587_v18 = vmul.f32 %v2623_v12, %v3438_v37  ;;  %v1226_v46 = vadd.f32 %v1144_v42, %v985_v36  ;;  %v4808_v41 = vrot.slane %v3191_v49, 2  ;;  %v1404_v1 = vrot.slane %v1281_v57, 2 }
  0x93   : > { %v616_v52 = vsel %vm546_vm1, %v4807_v14, %v615_v40  ;;  %v4809_v56 = vrot.slane %v3209_v58, 1  ;;  %v1508_v20 = vmul.f32 %v2621_v11, %v3204_v43  ;;  %v1828_v49 = vmul.f32 %v3473_v8, %v3438_v37 }
  0x94   : > { %v686_v9 = vadd.f32 %v616_v52, %v412_v59  ;;  %v858_v51 = vsel %vm788_vm2, %v4808_v41, %v857_v29  ;;  %v1710_v34 = vrot.slane %v1587_v18, 1  ;;  %v1467_v42 = vadd.f32 %v1385_v33, %v1226_v46 }
  0x95   : > { %v1164_v60 = vsel %vm546_vm1, %v4809_v56, %v1163_v50  ;;  %v388_v58 = vmul.f32 %v2597_v2, %v2788_v0  ;;  %v455_v61 = vmul.f32 %v2599_v3, %v3018_v32  ;;  %v4810_v27 = vrot.slane %v3220_v48, 2 }
  0x96   : > { %v928_v17 = vadd.f32 %v858_v51, %v686_v9  ;;  %v4811_v22 = vrot.slane %v3231_v53, 1  ;;  %v1951_v26 = vrot.slane %v1828_v49, 2  ;;  %v697_v40 = vmul.f32 %v2601_v4, %v3018_v32 }
  0x97   : > { %v1405_v59 = vsel %vm788_vm2, %v4810_v27, %v1404_v1  ;;  %v1532_v33 = vadd.f32 %v1500_v35, %v1467_v42  ;;  %v555_v0 = vrot.slane %v455_v61, 1  ;;  %v1004_v36 = vmul.f32 %v2605_v6, %v3031_v47  ;;  %v4815_v1 = vld [vmem:[#allocation14_spill] sm:$0xff] }
  0x98   : > { %v1711_v45 = vsel %vm546_vm1, %v4811_v22, %v1710_v34  ;;  %v993_v24 = vadd.f32 %v961_v28, %v928_v17  ;;  %v4812_v48 = vrot.slane %v3243_v30, 2  ;;  %v797_v57 = vrot.slane %v697_v40, 2  ;;  %v4820_v22 = vld [vmem:[#allocation15_spill] sm:$0xff] }
  0x99   : > { %v937_v53 = vmul.f32 %v2603_v5, %v2819_v38  ;;  %v1245_v14 = vmul.f32 %v2612_v7, %v3031_v47  ;;  %v1773_v32 = vadd.f32 %v1691_v62, %v1532_v33  ;;  %v4813_v52 = vrot.slane %v3256_v15, 1  ;;  %v3528_v33 = vld [vmem:[%s2610_s29 + $0xb8] sm:$0x3] }
  0x9a   : > { %v1952_v29 = vsel %vm788_vm2, %v4812_v48, %v1951_v26  ;;  %v1234_v35 = vadd.f32 %v1164_v60, %v993_v24  ;;  %v1103_v50 = vrot.slane %v1004_v36, 1  ;;  %v4814_v46 = vrot.slane %v3265_v25, 2  ;;  %v4817_v60 = vld [vmem:[#allocation3_spill] sm:$0xff]  ;;  %4822 = vst [vmem:[#allocation7_spill] sm:$0xff] %v3528_v33  ;;  %v4823_v24 = vld [vmem:[#allocation9_spill] sm:$0xff]  ;;  %v4824_v36 = vld [vmem:[#allocation18_spill] sm:$0xff] }
  0x9b   : > { %v556_v28 = vsel %vm546_vm1, %v4813_v52, %v555_v0  ;;  %v1344_v9 = vrot.slane %v1245_v14, 2  ;;  %v1551_v41 = vmul.f32 %v2623_v12, %v3490_v13  ;;  %v2014_v38 = vadd.f32 %v1932_v55, %v1773_v32  ;;  %v4825_v32 = vld [vmem:[#allocation13_spill] sm:$0xff] }
  0x9c   : > { %v662_v18 = vadd.f32 %v556_v28, %v388_v58  ;;  %v798_v30 = vsel %vm788_vm2, %v4814_v46, %v797_v57  ;;  %v1475_v51 = vadd.f32 %v1405_v59, %v1234_v35  ;;  %v1484_v47 = vmul.f32 %v2621_v11, %v3276_v31  ;;  %v4819_v58 = vld [vmem:[#allocation17_spill] sm:$0xff] }
  0x9d   : > { %v1792_v15 = vmul.f32 %v3473_v8, %v3490_v13  ;;  %v4816_v56 = vrot.slane %v4815_v1, 1  ;;  %v4818_v34 = vrot.slane %v4817_v60, 2  ;;  %v1650_v42 = vrot.slane %v1551_v41, 1  ;;  %2425 = vmatmul.msk.f32.gmra.mxu2 %vm2032_vm3, %v2014_v38  ;;  %v2473_v60 = vld [vmem:[%s2610_s29 + $0xf0] sm:$0xff] }
  0x9e   : > { %v904_v62 = vadd.f32 %v798_v30, %v662_v18  ;;  %v1540_v55 = vadd.f32 %v1508_v20, %v1475_v51  ;;  %v467_v61 = vmul.f32 %v2599_v3, %v4819_v58  ;;  %v709_v27 = vmul.f32 %v2601_v4, %v4819_v58  ;;  %v4827_v30 = vld [vmem:[#allocation4_spill] sm:$0xff] }
  0x9f   : > { %v1104_v25 = vsel %vm546_vm1, %v4816_v56, %v1103_v50  ;;  %v1345_v49 = vsel %vm788_vm2, %v4818_v34, %v1344_v9  ;;  %v1891_v17 = vrot.slane %v1792_v15, 2  ;;  %v4821_v26 = vrot.slane %v4820_v22, 1 }
  0xa0   : > { %v969_v59 = vadd.f32 %v937_v53, %v904_v62  ;;  %v396_v0 = vmul.f32 %v2597_v2, %v4823_v24  ;;  %v1016_v20 = vmul.f32 %v2605_v6, %v4824_v36  ;;  %v1781_v48 = vadd.f32 %v1711_v45, %v1540_v55 }
  0xa1   : > { %v1651_v40 = vsel %vm546_vm1, %v4821_v26, %v1650_v42  ;;  %v575_v57 = vrot.slane %v467_v61, 1  ;;  %v817_v14 = vrot.slane %v709_v27, 2  ;;  %v945_v35 = vmul.f32 %v2603_v5, %v4825_v32 }
  0xa2   : > { %v1210_v52 = vadd.f32 %v1104_v25, %v969_v59  ;;  %v4826_v53 = vrot.slane %v3316_v44, 2  ;;  %v1123_v50 = vrot.slane %v1016_v20, 1  ;;  %v1257_v18 = vmul.f32 %v2612_v7, %v4824_v36 }
  0xa3   : > { %v2022_v46 = vadd.f32 %v1952_v29, %v1781_v48  ;;  %v4828_v9 = vrot.slane %v4827_v30, 1  ;;  %v4829_v41 = vrot.slane %v3338_v63, 2  ;;  %v1563_v44 = vmul.f32 %v2623_v12, %v3528_v33 }
  0xa4   : > { %v1892_v28 = vsel %vm788_vm2, %v4826_v53, %v1891_v17  ;;  %v1451_v51 = vadd.f32 %v1345_v49, %v1210_v52  ;;  %v1364_v62 = vrot.slane %v1257_v18, 2  ;;  %v1492_v1 = vmul.f32 %v2621_v11, %v3354_v39  ;;  %v3561_v17 = vld [vmem:[%s2610_s29 + $0xf8] sm:$0xff] }
  0xa5   : > { %v576_v45 = vsel %vm546_vm1, %v4828_v9, %v575_v57  ;;  %v818_v38 = vsel %vm788_vm2, %v4829_v41, %v817_v14  ;;  %2433 = vmatmul.msk.f32.gmra.mxu3 %vm2032_vm3, %v2022_v46  ;;  %v4830_v29 = vrot.slane %v3351_v54, 1  ;;  %v1670_v25 = vrot.slane %v1563_v44, 1 }
  0xa6   : > { %v670_v15 = vadd.f32 %v576_v45, %v396_v0  ;;  %v1804_v63 = vmul.f32 %v3473_v8, %v3528_v33  ;;  %v480_v34 = vmul.f32 %v2473_v60, %v2599_v3  ;;  %v1516_v42 = vadd.f32 %v1484_v47, %v1451_v51  ;;  %v3606_v51 = vld [vmem:[%s2610_s29 + $0x120] sm:$0xff] }
  0xa7   : > { %v1124_v56 = vsel %vm546_vm1, %v4830_v29, %v1123_v50  ;;  %v405_v55 = vmul.f32 %v2473_v60, %v2597_v2  ;;  %v3565_v58 = vmul.f32 %v3561_v17, %v2599_v3  ;;  %v4831_v54 = vrot.slane %v3363_v16, 2  ;;  %v4833_v16 = vld [vmem:[#allocation10_spill] sm:$0xff]  ;;  %4835 = vst [vmem:[#allocation8_spill] sm:$0xff] %v3606_v51  ;;  %v3612_v29 = vld [vmem:[%s2610_s29 + $0x128] sm:$0xff] }
  0xa8   : > { %v912_v49 = vadd.f32 %v818_v38, %v670_v15  ;;  %v1911_v27 = vrot.slane %v1804_v63, 2  ;;  %v597_v59 = vrot.slane %v480_v34, 1  ;;  %v722_v22 = vmul.f32 %v2473_v60, %v2601_v4 }
  0xa9   : > { %v1365_v61 = vsel %vm788_vm2, %v4831_v54, %v1364_v62  ;;  %v1757_v26 = vadd.f32 %v1651_v40, %v1516_v42  ;;  %v4681_v47 = vrot.slane %v3565_v58, 1  ;;  %v3574_v0 = vmul.f32 %v3561_v17, %v2601_v4 }
  0xaa   : > { %v977_v24 = vadd.f32 %v945_v35, %v912_v49  ;;  %v4832_v36 = vrot.slane %v3379_v19, 1  ;;  %v839_v48 = vrot.slane %v722_v22, 2  ;;  %v954_v57 = vmul.f32 %v2603_v5, %v4833_v16  ;;  %v2477_v22 = vld [vmem:[%s2610_s29 + $0x150] sm:$0xff] }
  0xab   : > { %v1029_v14 = vmul.f32 %v2605_v6, %v4833_v16  ;;  %v1998_v32 = vadd.f32 %v1892_v28, %v1757_v26  ;;  %v599_v35 = vsel %vm546_vm1, %v597_v59, %v4681_v47  ;;  %v4680_v52 = vrot.slane %v3574_v0, 2  ;;  %v2483_v47 = vld [vmem:[%s2610_s29 + $0x90] sm:$0xff] }
  0xac   : > { %v1671_v20 = vsel %vm546_vm1, %v4832_v36, %v1670_v25  ;;  %v1218_v40 = vadd.f32 %v1124_v56, %v977_v24  ;;  %v679_v53 = vadd.f32 %v599_v35, %v405_v55  ;;  %v3589_v19 = vmul.f32 %v2605_v6, %v3133_v21 }
  0xad   : > { %v1145_v50 = vrot.slane %v1029_v14, 1  ;;  %v1270_v18 = vmul.f32 %v2612_v7, %v4833_v16  ;;  %2409 = vmatmul.msk.f32.gmra.mxu0 %vm2032_vm3, %v1998_v32  ;;  %v4834_v46 = vrot.slane %v3388_v10, 2  ;;  %v841_v9 = vsel %vm788_vm2, %v839_v48, %v4680_v52 }
  0xae   : > { %v1459_v28 = vadd.f32 %v1365_v61, %v1218_v40  ;;  %v3602_v45 = vmul.f32 %v2612_v7, %v3133_v21  ;;  %v921_v41 = vadd.f32 %v841_v9, %v679_v53  ;;  %v4679_v38 = vrot.slane %v3589_v19, 1  ;;  %v3669_v9 = vld [vmem:[%s3640_s12 + $0x8] sm:$0xff] }
  0xaf   : > { %v1912_v30 = vsel %vm788_vm2, %v4834_v46, %v1911_v27  ;;  %v1386_v44 = vrot.slane %v1270_v18, 2  ;;  %v1576_v15 = vmul.f32 %v3606_v51, %v2623_v12  ;;  %v3616_v56 = vmul.f32 %v3612_v29, %v2623_v12  ;;  %v4836_v18 = vld [vmem:[#allocation12_spill] sm:$0xff] }
  0xb0   : > { %v1524_v10 = vadd.f32 %v1492_v1, %v1459_v28  ;;  %v4675_v62 = vrot.slane %v3602_v45, 2  ;;  %v1817_v25 = vmul.f32 %v3606_v51, %v3473_v8  ;;  %v986_v63 = vadd.f32 %v954_v57, %v921_v41 }
  0xb1   : > { %v1147_v60 = vsel %vm546_vm1, %v1145_v50, %v4679_v38  ;;  %v1692_v1 = vrot.slane %v1576_v15, 1  ;;  %v3626_v34 = vmul.f32 %v3612_v29, %v3473_v8  ;;  %v4674_v55 = vrot.slane %v3616_v56, 1 }
  0xb2   : > { %v1765_v42 = vadd.f32 %v1671_v20, %v1524_v10  ;;  %v1388_v49 = vsel %vm788_vm2, %v1386_v44, %v4675_v62  ;;  %v1933_v54 = vrot.slane %v1817_v25, 2  ;;  %v1227_v61 = vadd.f32 %v1147_v60, %v986_v63  ;;  %v3644_v20 = vld [vmem:[%s2610_s29 + $0x158] sm:$0xff] }
  0xb3   : > { %v1501_v27 = vmul.f32 %v3606_v51, %v2621_v11  ;;  %v4673_v59 = vrot.slane %v3626_v34, 2  ;;  %v492_v26 = vmul.f32 %v2477_v22, %v2599_v3  ;;  %v413_v36 = vmul.f32 %v2477_v22, %v2597_v2 }
  0xb4   : > { %v2006_v24 = vadd.f32 %v1912_v30, %v1765_v42  ;;  %v3648_v48 = vmul.f32 %v3644_v20, %v2599_v3  ;;  %v734_v16 = vmul.f32 %v2477_v22, %v2601_v4  ;;  %v1468_v57 = vadd.f32 %v1388_v49, %v1227_v61  ;;  %v3666_v30 = vld [vmem:[%s3640_s12] sm:$0xff] }
  0xb5   : > { %v1694_v14 = vsel %vm546_vm1, %v1692_v1, %v4674_v55  ;;  %v617_v32 = vrot.slane %v492_v26, 1  ;;  %v3656_v40 = vmul.f32 %v3644_v20, %v2601_v4  ;;  %v1935_v35 = vsel %vm788_vm2, %v1933_v54, %v4673_v59  ;;  %4837 = vst [vmem:[#allocation11_spill] sm:$0xff] %v3666_v30 }
  0xb6   : > { %2417 = vmatmul.msk.f32.gmra.mxu1 %vm2032_vm3, %v2006_v24  ;;  %v4672_v53 = vrot.slane %v3648_v48, 1  ;;  %v859_v50 = vrot.slane %v734_v16, 2  ;;  %v1041_v28 = vmul.f32 %v2605_v6, %v4836_v18  ;;  %v1533_v46 = vadd.f32 %v1501_v27, %v1468_v57 }
  0xb7   : > { %v4670_v41 = vrot.slane %v3656_v40, 2  ;;  %v3674_v44 = vmul.f32 %v2605_v6, %v3204_v43  ;;  %v1282_v15 = vmul.f32 %v2612_v7, %v4836_v18  ;;  %v962_v25 = vmul.f32 %v2603_v5, %v4836_v18 }
  0xb8   : > { %v619_v10 = vsel %vm546_vm1, %v617_v32, %v4672_v53  ;;  %v1165_v63 = vrot.slane %v1041_v28, 1  ;;  %v3685_v60 = vmul.f32 %v2612_v7, %v3204_v43  ;;  %v1774_v1 = vadd.f32 %v1694_v14, %v1533_v46 }
  0xb9   : > { %v687_v42 = vadd.f32 %v619_v10, %v413_v36  ;;  %v861_v49 = vsel %vm788_vm2, %v859_v50, %v4670_v41  ;;  %v4669_v54 = vrot.slane %v3674_v44, 1  ;;  %v1406_v61 = vrot.slane %v1282_v15, 2  ;;  %v2479_v15 = vld [vmem:[%s2610_s29 + $0x30] sm:$0xff] }
  0xba   : > { %v4668_v27 = vrot.slane %v3685_v60, 2  ;;  %v1588_v22 = vmul.f32 %v2623_v12, %v3666_v30  ;;  %v3696_v26 = vmul.f32 %v2623_v12, %v3669_v9  ;;  %v2015_v24 = vadd.f32 %v1935_v35, %v1774_v1 }
  0xbb   : > { %v929_v36 = vadd.f32 %v861_v49, %v687_v42  ;;  %v1509_v16 = vmul.f32 %v2621_v11, %v3666_v30  ;;  %v1829_v57 = vmul.f32 %v3473_v8, %v3666_v30  ;;  %v1167_v14 = vsel %vm546_vm1, %v1165_v63, %v4669_v54  ;;  %v3719_v42 = vld [vmem:[%s2610_s29 + $0x38] sm:$0xff]  ;;  %v4838_v54 = vld [vmem:[#allocation2_spill] sm:$0xff] }
  0xbc   : > { %v1712_v32 = vrot.slane %v1588_v22, 1  ;;  %v4671_v50 = vrot.slane %v3696_v26, 1  ;;  %v3708_v18 = vmul.f32 %v3473_v8, %v3669_v9  ;;  %2426 = vmatmul.msk.f32.gmra.mxu2 %vm2032_vm3, %v2015_v24  ;;  %v1408_v28 = vsel %vm788_vm2, %v1406_v61, %v4668_v27 }
  0xbd   : > { %v994_v35 = vadd.f32 %v962_v25, %v929_v36  ;;  %v1953_v46 = vrot.slane %v1829_v57, 2  ;;  %v456_v10 = vmul.f32 %v2479_v15, %v2599_v3  ;;  %v389_v1 = vmul.f32 %v2479_v15, %v2597_v2 }
  0xbe   : > { %v4676_v63 = vrot.slane %v3708_v18, 2  ;;  %v3723_v49 = vmul.f32 %v3719_v42, %v2599_v3  ;;  %v698_v25 = vmul.f32 %v2479_v15, %v2601_v4  ;;  %v1714_v61 = vsel %vm546_vm1, %v1712_v32, %v4671_v50 }
  0xbf   : > { %v1235_v22 = vadd.f32 %v1167_v14, %v994_v35  ;;  %v557_v24 = vrot.slane %v456_v10, 1  ;;  %v3731_v36 = vmul.f32 %v3719_v42, %v2601_v4  ;;  %v938_v41 = vmul.f32 %v2603_v5, %v4838_v54 }
  0xc0   : > { %v4678_v57 = vrot.slane %v3723_v49, 1  ;;  %v799_v27 = vrot.slane %v698_v25, 2  ;;  %v1005_v15 = vmul.f32 %v2605_v6, %v4838_v54  ;;  %v3741_v32 = vmul.f32 %v2605_v6, %v3276_v31 }
  0xc1   : > { %v1476_v14 = vadd.f32 %v1408_v28, %v1235_v22  ;;  %v4677_v35 = vrot.slane %v3731_v36, 2  ;;  %v1246_v10 = vmul.f32 %v2612_v7, %v4838_v54  ;;  %v1955_v25 = vsel %vm788_vm2, %v1953_v46, %v4676_v63  ;;  %v3761_v63 = vld [vmem:[%s2610_s29 + $0x60] sm:$0xff] }
  0xc2   : > { %v559_v50 = vsel %vm546_vm1, %v557_v24, %v4678_v57  ;;  %v1105_v53 = vrot.slane %v1005_v15, 1  ;;  %v3753_v28 = vmul.f32 %v2612_v7, %v3276_v31  ;;  %v4682_v54 = vrot.slane %v3741_v32, 1  ;;  %4839 = vst [vmem:[#allocation16_spill] sm:$0xff] %v3761_v63  ;;  %v3766_v15 = vld [vmem:[%s2610_s29 + $0x68] sm:$0xff] }
  0xc3   : > { %v1541_v22 = vadd.f32 %v1509_v16, %v1476_v14  ;;  %v663_v59 = vadd.f32 %v559_v50, %v389_v1  ;;  %v801_v55 = vsel %vm788_vm2, %v799_v27, %v4677_v35  ;;  %v1346_v62 = vrot.slane %v1246_v10, 2 }
  0xc4   : > { %v4684_v46 = vrot.slane %v3753_v28, 2  ;;  %v1552_v24 = vmul.f32 %v3761_v63, %v2623_v12  ;;  %v3770_v16 = vmul.f32 %v3766_v15, %v2623_v12  ;;  %v1485_v1 = vmul.f32 %v3761_v63, %v2621_v11 }
  0xc5   : > { %v1782_v50 = vadd.f32 %v1714_v61, %v1541_v22  ;;  %v905_v27 = vadd.f32 %v801_v55, %v663_v59  ;;  %v1793_v14 = vmul.f32 %v3761_v63, %v3473_v8  ;;  %v1107_v10 = vsel %vm546_vm1, %v1105_v53, %v4682_v54  ;;  %v3794_v54 = vld [vmem:[%s2610_s29 + $0x98] sm:$0xff] }
  0xc6   : > { %v1652_v35 = vrot.slane %v1552_v24, 1  ;;  %v4683_v57 = vrot.slane %v3770_v16, 1  ;;  %v3782_v38 = vmul.f32 %v3766_v15, %v3473_v8  ;;  %v1348_v55 = vsel %vm788_vm2, %v1346_v62, %v4684_v46 }
  0xc7   : > { %v2023_v61 = vadd.f32 %v1955_v25, %v1782_v50  ;;  %v970_v22 = vadd.f32 %v938_v41, %v905_v27  ;;  %v1893_v59 = vrot.slane %v1793_v14, 2  ;;  %v397_v53 = vmul.f32 %v2483_v47, %v2597_v2 }
  0xc8   : > { %v1654_v52 = vsel %vm546_vm1, %v1652_v35, %v4683_v57  ;;  %v468_v24 = vmul.f32 %v2483_v47, %v2599_v3  ;;  %v3798_v25 = vmul.f32 %v3794_v54, %v2599_v3  ;;  %v710_v50 = vmul.f32 %v2483_v47, %v2601_v4  ;;  %v4842_v57 = vld [vmem:[#allocation5_spill] sm:$0xff] }
  0xc9   : > { %2434 = vmatmul.msk.f32.gmra.mxu3 %vm2032_vm3, %v2023_v61  ;;  %v1211_v41 = vadd.f32 %v1107_v10, %v970_v22  ;;  %v3805_v35 = vmul.f32 %v3794_v54, %v2601_v4  ;;  %v946_v46 = vmul.f32 %v2603_v5, %v4842_v57  ;;  %v1017_v63 = vmul.f32 %v2605_v6, %v4842_v57 }
  0xca   : > { %4840 = vst [vmem:[#allocation14_spill] sm:$0xff] %v3798_v25  ;;  %v577_v27 = vrot.slane %v468_v24, 1  ;;  %v4694_v14 = vrot.slane %v3798_v25, 1  ;;  %v819_v10 = vrot.slane %v710_v50, 2  ;;  %v3815_v47 = vmul.f32 %v2605_v6, %v3354_v39 }
  0xcb   : > { %4841 = vst [vmem:[#allocation3_spill] sm:$0xff] %v3805_v35  ;;  %v1452_v61 = vadd.f32 %v1348_v55, %v1211_v41  ;;  %v4696_v22 = vrot.slane %v3805_v35, 2  ;;  %v1125_v62 = vrot.slane %v1017_v63, 1  ;;  %v1258_v30 = vmul.f32 %v2612_v7, %v4842_v57  ;;  %v3835_v57 = vld [vmem:[%s2610_s29 + $0xc0] sm:$0xff] }
  0xcc   : > { %4843 = vst [vmem:[#allocation17_spill] sm:$0xff] %v3815_v47  ;;  %v579_v24 = vsel %vm546_vm1, %v577_v27, %v4694_v14  ;;  %v3824_v51 = vmul.f32 %v2612_v7, %v3354_v39  ;;  %v4699_v33 = vrot.slane %v3815_v47, 1  ;;  %v4844_v25 = vrot.slane %v3782_v38, 2 }
  0xcd   : > { %v1517_v55 = vadd.f32 %v1485_v1, %v1452_v61  ;;  %v671_v41 = vadd.f32 %v579_v24, %v397_v53  ;;  %v821_v50 = vsel %vm788_vm2, %v819_v10, %v4696_v22  ;;  %v1366_v63 = vrot.slane %v1258_v30, 2  ;;  %4845 = vst [vmem:[#allocation15_spill] sm:$0xff] %v3835_v57  ;;  %v3842_v10 = vld [vmem:[%s2610_s29 + $0xc8] sm:$0xff] }
  0xce   : > { %v1895_v27 = vsel %vm788_vm2, %v1893_v59, %v4844_v25  ;;  %v4704_v14 = vrot.slane %v3824_v51, 2  ;;  %v1564_v39 = vmul.f32 %v3835_v57, %v2623_v12  ;;  %v1493_v61 = vmul.f32 %v3835_v57, %v2621_v11  ;;  %4846 = vst [vmem:[#allocation9_spill] sm:$0xff] %v3842_v10 }
  0xcf   : > { %v1758_v1 = vadd.f32 %v1654_v52, %v1517_v55  ;;  %v913_v53 = vadd.f32 %v821_v50, %v671_v41  ;;  %v3846_v24 = vmul.f32 %v3842_v10, %v2623_v12  ;;  %v1127_v30 = vsel %vm546_vm1, %v1125_v62, %v4699_v33 }
  0xd0   : > { %v1672_v59 = vrot.slane %v1564_v39, 1  ;;  %v1805_v25 = vmul.f32 %v3835_v57, %v3473_v8  ;;  %v3855_v52 = vmul.f32 %v3842_v10, %v3473_v8  ;;  %v1368_v50 = vsel %vm788_vm2, %v1366_v63, %v4704_v14  ;;  %v2487_v39 = vld [vmem:[%s2610_s29 + $0x100] sm:$0x3] }
  0xd1   : > { %v1999_v55 = vadd.f32 %v1895_v27, %v1758_v1  ;;  %v978_v41 = vadd.f32 %v946_v46, %v913_v53  ;;  %v4703_v22 = vrot.slane %v3846_v24, 1  ;;  %v482_v62 = vmul.f32 %v2487_v39, %v2599_v3 }
  0xd2   : > { %v1913_v35 = vrot.slane %v1805_v25, 2  ;;  %v4702_v47 = vrot.slane %v3855_v52, 2  ;;  %v724_v33 = vmul.f32 %v2487_v39, %v2601_v4  ;;  %v406_v27 = vmul.f32 %v3561_v17, %v2597_v2 }
  0xd3   : > { %2410 = vmatmul.msk.f32.gmra.mxu0 %vm2032_vm3, %v1999_v55  ;;  %v1219_v57 = vadd.f32 %v1127_v30, %v978_v41  ;;  %v1674_v46 = vsel %vm546_vm1, %v1672_v59, %v4703_v22  ;;  %v1031_v63 = vmul.f32 %v2605_v6, %v3396_v23  ;;  %v600_v1 = vrot.slane %v482_v62, 1  ;;  %v3881_v41 = vld [vmem:[%s2610_s29 + $0x130] sm:$0x3] }
  0xd4   : > { %v842_v53 = vrot.slane %v724_v33, 2  ;;  %v955_v25 = vmul.f32 %v2603_v5, %v3133_v21  ;;  %v1272_v39 = vmul.f32 %v2612_v7, %v3396_v23  ;;  %v1915_v30 = vsel %vm788_vm2, %v1913_v35, %v4702_v47  ;;  %4847 = vst [vmem:[#allocation18_spill] sm:$0xff] %v3881_v41 }
  0xd5   : > { %v1460_v55 = vadd.f32 %v1368_v50, %v1219_v57  ;;  %v1148_v59 = vrot.slane %v1031_v63, 1  ;;  %v1578_v17 = vmul.f32 %v3881_v41, %v2623_v12  ;;  %v4848_v33 = vrot.slane %v3565_v58, 1 }
  0xd6   : > { %v4849_v62 = vrot.slane %v3574_v0, 2  ;;  %v1389_v57 = vrot.slane %v1272_v39, 2  ;;  %v1819_v50 = vmul.f32 %v3881_v41, %v3473_v8  ;;  %v1502_v47 = vmul.f32 %v3612_v29, %v2621_v11 }
  0xd7   : > { %v601_v21 = vsel %vm546_vm1, %v4848_v33, %v600_v1  ;;  %v1525_v35 = vadd.f32 %v1493_v61, %v1460_v55  ;;  %v1695_v22 = vrot.slane %v1578_v17, 1  ;;  %v4850_v14 = vrot.slane %v3589_v19, 1  ;;  %v3904_v61 = vld [vmem:[%s3640_s12 + $0x10] sm:$0x3] }
  0xd8   : > { %v843_v23 = vsel %vm788_vm2, %v4849_v62, %v842_v53  ;;  %v680_v63 = vadd.f32 %v601_v21, %v406_v27  ;;  %v4851_v1 = vrot.slane %v3602_v45, 2  ;;  %v1936_v33 = vrot.slane %v1819_v50, 2  ;;  %v2489_v53 = vld [vmem:[%s2610_s29 + $0x160] sm:$0x3] }
  0xd9   : > { %v1149_v58 = vsel %vm546_vm1, %v4850_v14, %v1148_v59  ;;  %v494_v39 = vmul.f32 %v2489_v53, %v2599_v3  ;;  %v1766_v62 = vadd.f32 %v1674_v46, %v1525_v35  ;;  %v414_v27 = vmul.f32 %v3644_v20, %v2597_v2 }
  0xda   : > { %v1390_v0 = vsel %vm788_vm2, %v4851_v1, %v1389_v57  ;;  %v922_v41 = vadd.f32 %v843_v23, %v680_v63  ;;  %v736_v55 = vmul.f32 %v2489_v53, %v2601_v4  ;;  %v4852_v19 = vrot.slane %v3616_v56, 1 }
  0xdb   : > { %v4853_v45 = vrot.slane %v3626_v34, 2  ;;  %v620_v17 = vrot.slane %v494_v39, 1  ;;  %v1043_v46 = vmul.f32 %v2605_v6, %v3438_v37  ;;  %v2007_v21 = vadd.f32 %v1915_v30, %v1766_v62 }
  0xdc   : > { %v1696_v14 = vsel %vm546_vm1, %v4852_v19, %v1695_v22  ;;  %v987_v23 = vadd.f32 %v955_v25, %v922_v41  ;;  %v862_v57 = vrot.slane %v736_v55, 2  ;;  %v1284_v20 = vmul.f32 %v2612_v7, %v3438_v37 }
  0xdd   : > { %v1937_v59 = vsel %vm788_vm2, %v4853_v45, %v1936_v33  ;;  %v4854_v50 = vrot.slane %v3648_v48, 1  ;;  %v963_v34 = vmul.f32 %v2603_v5, %v3204_v43  ;;  %v1168_v22 = vrot.slane %v1043_v46, 1  ;;  %2418 = vmatmul.msk.f32.gmra.mxu1 %vm2032_vm3, %v2007_v21 }
  0xde   : > { %v1590_v35 = vmul.f32 %v2623_v12, %v3904_v61  ;;  %v1228_v30 = vadd.f32 %v1149_v58, %v987_v23  ;;  %v4855_v41 = vrot.slane %v3656_v40, 2  ;;  %v1409_v63 = vrot.slane %v1284_v20, 2  ;;  %v2490_v40 = vld [vmem:[%s2610_s29 + $0x40] sm:$0x3] }
  0xdf   : > { %v621_v56 = vsel %vm546_vm1, %v4854_v50, %v620_v17  ;;  %v4856_v48 = vrot.slane %v3674_v44, 1  ;;  %v1510_v43 = vmul.f32 %v2621_v11, %v3669_v9  ;;  %v1831_v53 = vmul.f32 %v3473_v8, %v3904_v61 }
  0xe0   : > { %v688_v25 = vadd.f32 %v621_v56, %v414_v27  ;;  %v863_v37 = vsel %vm788_vm2, %v4855_v41, %v862_v57  ;;  %v1715_v33 = vrot.slane %v1590_v35, 1  ;;  %v1469_v39 = vadd.f32 %v1390_v0, %v1228_v30 }
  0xe1   : > { %v1169_v1 = vsel %vm546_vm1, %v4856_v48, %v1168_v22  ;;  %v390_v58 = vmul.f32 %v3719_v42, %v2597_v2  ;;  %v458_v27 = vmul.f32 %v2490_v40, %v2599_v3  ;;  %v4857_v55 = vrot.slane %v3685_v60, 2 }
  0xe2   : > { %v930_v62 = vadd.f32 %v863_v37, %v688_v25  ;;  %v4858_v19 = vrot.slane %v3696_v26, 1  ;;  %v1956_v17 = vrot.slane %v1831_v53, 2  ;;  %v700_v46 = vmul.f32 %v2490_v40, %v2601_v4  ;;  %v3964_v37 = vld [vmem:[%s2610_s29 + $0x70] sm:$0x3] }
  0xe3   : > { %v1410_v44 = vsel %vm788_vm2, %v4857_v55, %v1409_v63  ;;  %v1534_v0 = vadd.f32 %v1502_v47, %v1469_v39  ;;  %v560_v23 = vrot.slane %v458_v27, 1  ;;  %v1007_v42 = vmul.f32 %v2605_v6, %v3490_v13 }
  0xe4   : > { %v1716_v45 = vsel %vm546_vm1, %v4858_v19, %v1715_v33  ;;  %v995_v21 = vadd.f32 %v963_v34, %v930_v62  ;;  %v4859_v57 = vrot.slane %v3708_v18, 2  ;;  %v802_v20 = vrot.slane %v700_v46, 2  ;;  %v4865_v19 = vld [vmem:[#allocation7_spill] sm:$0xff] }
  0xe5   : > { %v939_v26 = vmul.f32 %v2603_v5, %v3276_v31  ;;  %v1248_v50 = vmul.f32 %v2612_v7, %v3490_v13  ;;  %v1775_v56 = vadd.f32 %v1696_v14, %v1534_v0  ;;  %v4860_v47 = vrot.slane %v3723_v49, 1 }
  0xe6   : > { %v1957_v60 = vsel %vm788_vm2, %v4859_v57, %v1956_v17  ;;  %v1236_v22 = vadd.f32 %v1169_v1, %v995_v21  ;;  %v1108_v35 = vrot.slane %v1007_v42, 1  ;;  %v4861_v25 = vrot.slane %v3731_v36, 2  ;;  %v4866_v21 = vld [vmem:[#allocation6_spill] sm:$0xff] }
  0xe7   : > { %v561_v34 = vsel %vm546_vm1, %v4860_v47, %v560_v23  ;;  %v1349_v41 = vrot.slane %v1248_v50, 2  ;;  %v1554_v31 = vmul.f32 %v3964_v37, %v2623_v12  ;;  %v2016_v13 = vadd.f32 %v1937_v59, %v1775_v56  ;;  %v4868_v50 = vld [vmem:[#allocation14_spill] sm:$0xff] }
  0xe8   : > { %v664_v30 = vadd.f32 %v561_v34, %v390_v58  ;;  %v803_v18 = vsel %vm788_vm2, %v4861_v25, %v802_v20  ;;  %v1477_v14 = vadd.f32 %v1410_v44, %v1236_v22  ;;  %v1486_v49 = vmul.f32 %v3766_v15, %v2621_v11  ;;  %v2492_v58 = vld [vmem:[%s2610_s29 + $0xa0] sm:$0x3]  ;;  %v4870_v22 = vld [vmem:[#allocation3_spill] sm:$0xff] }
  0xe9   : > { %v1795_v63 = vmul.f32 %v3964_v37, %v3473_v8  ;;  %v4862_v36 = vrot.slane %v3741_v32, 1  ;;  %v4863_v33 = vrot.slane %v3753_v28, 2  ;;  %v1655_v39 = vrot.slane %v1554_v31, 1  ;;  %2427 = vmatmul.msk.f32.gmra.mxu2 %vm2032_vm3, %v2016_v13 }
  0xea   : > { %v906_v48 = vadd.f32 %v803_v18, %v664_v30  ;;  %v1542_v59 = vadd.f32 %v1510_v43, %v1477_v14  ;;  %v470_v40 = vmul.f32 %v2492_v58, %v2599_v3  ;;  %v712_v27 = vmul.f32 %v2492_v58, %v2601_v4 }
  0xeb   : > { %v1109_v1 = vsel %vm546_vm1, %v4862_v36, %v1108_v35  ;;  %v1350_v53 = vsel %vm788_vm2, %v4863_v33, %v1349_v41  ;;  %v1896_v62 = vrot.slane %v1795_v63, 2  ;;  %v4864_v32 = vrot.slane %v3770_v16, 1  ;;  %v4003_v35 = vld [vmem:[%s2610_s29 + $0xd0] sm:$0x3]  ;;  %v4872_v41 = vld [vmem:[#allocation17_spill] sm:$0xff] }
  0xec   : > { %v971_v55 = vadd.f32 %v939_v26, %v906_v48  ;;  %v398_v28 = vmul.f32 %v3794_v54, %v2597_v2  ;;  %v1019_v17 = vmul.f32 %v2605_v6, %v4865_v19  ;;  %v1783_v46 = vadd.f32 %v1716_v45, %v1542_v59  ;;  %v2494_v48 = vld [vmem:[%s2610_s29 + $0x108] sm:$0xff] }
  0xed   : > { %v1656_v44 = vsel %vm546_vm1, %v4864_v32, %v1655_v39  ;;  %v580_v43 = vrot.slane %v470_v40, 1  ;;  %v822_v0 = vrot.slane %v712_v27, 2  ;;  %v947_v23 = vmul.f32 %v2603_v5, %v4866_v21  ;;  %v4019_v39 = vld [vmem:[%s2610_s29 + $0x110] sm:$0xff] }
  0xee   : > { %v1212_v42 = vadd.f32 %v1109_v1, %v971_v55  ;;  %v4867_v57 = vrot.slane %v3782_v38, 2  ;;  %v1128_v16 = vrot.slane %v1019_v17, 1  ;;  %v1260_v26 = vmul.f32 %v2612_v7, %v4865_v19 }
  0xef   : > { %v2024_v54 = vadd.f32 %v1957_v60, %v1783_v46  ;;  %v4869_v56 = vrot.slane %v4868_v50, 1  ;;  %v4871_v47 = vrot.slane %v4870_v22, 2  ;;  %v1566_v38 = vmul.f32 %v4003_v35, %v2623_v12 }
  0xf0   : > { %v1897_v20 = vsel %vm788_vm2, %v4867_v57, %v1896_v62  ;;  %v1453_v30 = vadd.f32 %v1350_v53, %v1212_v42  ;;  %v1369_v18 = vrot.slane %v1260_v26, 2  ;;  %v1494_v60 = vmul.f32 %v3842_v10, %v2621_v11 }
  0xf1   : > { %v581_v45 = vsel %vm546_vm1, %v4869_v56, %v580_v43  ;;  %v823_v34 = vsel %vm788_vm2, %v4871_v47, %v822_v0  ;;  %2435 = vmatmul.msk.f32.gmra.mxu3 %vm2032_vm3, %v2024_v54  ;;  %v4873_v31 = vrot.slane %v4872_v41, 1  ;;  %v1675_v14 = vrot.slane %v1566_v38, 1  ;;  %v4067_v41 = vld [vmem:[%s2610_s29 + $0x140] sm:$0xff] }
  0xf2   : > { %v672_v25 = vadd.f32 %v581_v45, %v398_v28  ;;  %v1807_v63 = vmul.f32 %v4003_v35, %v3473_v8  ;;  %v483_v36 = vmul.f32 %v2494_v48, %v2599_v3  ;;  %v1518_v1 = vadd.f32 %v1486_v49, %v1453_v30  ;;  %v2496_v30 = vld [vmem:[%s2610_s29 + $0x138] sm:$0xff] }
  0xf3   : > { %v1129_v13 = vsel %vm546_vm1, %v4873_v31, %v1128_v16  ;;  %v407_v53 = vmul.f32 %v2494_v48, %v2597_v2  ;;  %v4023_v59 = vmul.f32 %v4019_v39, %v2599_v3  ;;  %v4874_v62 = vrot.slane %v3824_v51, 2  ;;  %v4876_v51 = vld [vmem:[#allocation8_spill] sm:$0xff] }
  0xf4   : > { %v914_v33 = vadd.f32 %v823_v34, %v672_v25  ;;  %v1916_v40 = vrot.slane %v1807_v63, 2  ;;  %v602_v27 = vrot.slane %v483_v36, 1  ;;  %v725_v55 = vmul.f32 %v2494_v48, %v2601_v4 }
  0xf5   : > { %v1370_v58 = vsel %vm788_vm2, %v4874_v62, %v1369_v18  ;;  %v1759_v32 = vadd.f32 %v1656_v44, %v1518_v1  ;;  %v4723_v49 = vrot.slane %v4023_v59, 1  ;;  %v4032_v19 = vmul.f32 %v4019_v39, %v2601_v4 }
  0xf6   : > { %v979_v28 = vadd.f32 %v947_v23, %v914_v33  ;;  %v4875_v17 = vrot.slane %v3846_v24, 1  ;;  %v844_v43 = vrot.slane %v725_v55, 2  ;;  %v956_v0 = vmul.f32 %v4876_v51, %v2603_v5 }
  0xf7   : > { %v1032_v21 = vmul.f32 %v4876_v51, %v2605_v6  ;;  %v2000_v42 = vadd.f32 %v1897_v20, %v1759_v32  ;;  %v604_v23 = vsel %vm546_vm1, %v602_v27, %v4723_v49  ;;  %v4722_v57 = vrot.slane %v4032_v19, 2  ;;  %v2498_v27 = vld [vmem:[%s2610_s29 + $0x168] sm:$0xff] }
  0xf8   : > { %v1676_v46 = vsel %vm546_vm1, %v4875_v17, %v1675_v14  ;;  %v1220_v44 = vadd.f32 %v1129_v13, %v979_v28  ;;  %v681_v16 = vadd.f32 %v604_v23, %v407_v53  ;;  %v4047_v24 = vmul.f32 %v3612_v29, %v2605_v6  ;;  %v4091_v17 = vld [vmem:[%s2610_s29 + $0x170] sm:$0xff] }
  0xf9   : > { %v1150_v26 = vrot.slane %v1032_v21, 1  ;;  %v1273_v54 = vmul.f32 %v4876_v51, %v2612_v7  ;;  %2411 = vmatmul.msk.f32.gmra.mxu0 %vm2032_vm3, %v2000_v42  ;;  %v4877_v50 = vrot.slane %v3855_v52, 2  ;;  %v846_v45 = vsel %vm788_vm2, %v844_v43, %v4722_v57 }
  0xfa   : > { %v1461_v20 = vadd.f32 %v1370_v58, %v1220_v44  ;;  %v4060_v22 = vmul.f32 %v3612_v29, %v2612_v7  ;;  %v923_v47 = vadd.f32 %v846_v45, %v681_v16  ;;  %v4721_v34 = vrot.slane %v4047_v24, 1 }
  0xfb   : > { %v1917_v56 = vsel %vm788_vm2, %v4877_v50, %v1916_v40  ;;  %v1391_v38 = vrot.slane %v1273_v54, 2  ;;  %v1579_v25 = vmul.f32 %v2496_v30, %v2623_v12  ;;  %v4071_v31 = vmul.f32 %v4067_v41, %v2623_v12  ;;  %v379_v50 = vld [vmem:[%s3640_s12 + $0x18] sm:$0xff] }
  0xfc   : > { %v1526_v18 = vadd.f32 %v1494_v60, %v1461_v20  ;;  %v4717_v52 = vrot.slane %v4060_v22, 2  ;;  %v1820_v13 = vmul.f32 %v2496_v30, %v3473_v8  ;;  %v988_v14 = vadd.f32 %v956_v0, %v923_v47 }
  0xfd   : > { %v1152_v63 = vsel %vm546_vm1, %v1150_v26, %v4721_v34  ;;  %v1697_v48 = vrot.slane %v1579_v25, 1  ;;  %v4079_v60 = vmul.f32 %v4067_v41, %v3473_v8  ;;  %v4711_v33 = vrot.slane %v4071_v31, 1  ;;  %v4878_v26 = vld [vmem:[#allocation11_spill] sm:$0xff] }
  0xfe   : > { %v1767_v36 = vadd.f32 %v1676_v46, %v1526_v18  ;;  %v1393_v1 = vsel %vm788_vm2, %v1391_v38, %v4717_v52  ;;  %v1938_v53 = vrot.slane %v1820_v13, 2  ;;  %v1229_v62 = vadd.f32 %v1152_v63, %v988_v14 }
  0xff   : > { %v1503_v58 = vmul.f32 %v2496_v30, %v2621_v11  ;;  %v4710_v40 = vrot.slane %v4079_v60, 2  ;;  %v495_v55 = vmul.f32 %v2498_v27, %v2599_v3  ;;  %v415_v28 = vmul.f32 %v2498_v27, %v2597_v2 }
 0x100   : > { %v2008_v32 = vadd.f32 %v1917_v56, %v1767_v36  ;;  %v4095_v46 = vmul.f32 %v4091_v17, %v2599_v3  ;;  %v737_v43 = vmul.f32 %v2498_v27, %v2601_v4  ;;  %v1470_v51 = vadd.f32 %v1393_v1, %v1229_v62  ;;  %v4114_v56 = vld [vmem:[%s3640_s12 + $0x20] sm:$0xff] }
 0x101   : > { %v1699_v0 = vsel %vm546_vm1, %v1697_v48, %v4711_v33  ;;  %v622_v21 = vrot.slane %v495_v55, 1  ;;  %v4103_v42 = vmul.f32 %v4091_v17, %v2601_v4  ;;  %v1940_v44 = vsel %vm788_vm2, %v1938_v53, %v4710_v40 }
 0x102   : > { %2419 = vmatmul.msk.f32.gmra.mxu1 %vm2032_vm3, %v2008_v32  ;;  %v4716_v23 = vrot.slane %v4095_v46, 1  ;;  %v864_v16 = vrot.slane %v737_v43, 2  ;;  %v1044_v54 = vmul.f32 %v2605_v6, %v4878_v26  ;;  %v1535_v20 = vadd.f32 %v1503_v58, %v1470_v51 }
 0x103   : > { %v4713_v45 = vrot.slane %v4103_v42, 2  ;;  %v4119_v47 = vmul.f32 %v2605_v6, %v3669_v9  ;;  %v1285_v38 = vmul.f32 %v2612_v7, %v4878_v26  ;;  %v964_v25 = vmul.f32 %v2603_v5, %v4878_v26 }
 0x104   : > { %v624_v30 = vsel %vm546_vm1, %v622_v21, %v4716_v23  ;;  %v1170_v18 = vrot.slane %v1044_v54, 1  ;;  %v4130_v13 = vmul.f32 %v2612_v7, %v3669_v9  ;;  %v1776_v14 = vadd.f32 %v1699_v0, %v1535_v20  ;;  %v2500_v54 = vld [vmem:[%s2610_s29 + $0x48] sm:$0xff] }
 0x105   : > { %v689_v63 = vadd.f32 %v624_v30, %v415_v28  ;;  %v866_v48 = vsel %vm788_vm2, %v864_v16, %v4713_v45  ;;  %v4709_v36 = vrot.slane %v4119_v47, 1  ;;  %v1411_v1 = vrot.slane %v1285_v38, 2  ;;  %v4161_v30 = vld [vmem:[%s2610_s29 + $0x50] sm:$0xff] }
 0x106   : > { %v4708_v53 = vrot.slane %v4130_v13, 2  ;;  %v1591_v62 = vmul.f32 %v2623_v12, %v379_v50  ;;  %v4140_v58 = vmul.f32 %v2623_v12, %v4114_v56  ;;  %v2017_v27 = vadd.f32 %v1940_v44, %v1776_v14 }
 0x107   : > { %v931_v55 = vadd.f32 %v866_v48, %v689_v63  ;;  %v1511_v32 = vmul.f32 %v2621_v11, %v379_v50  ;;  %v1832_v28 = vmul.f32 %v3473_v8, %v379_v50  ;;  %v1172_v43 = vsel %vm546_vm1, %v1170_v18, %v4709_v36 }
 0x108   : > { %v1717_v51 = vrot.slane %v1591_v62, 1  ;;  %v4707_v0 = vrot.slane %v4140_v58, 1  ;;  %v4150_v21 = vmul.f32 %v3473_v8, %v4114_v56  ;;  %2428 = vmatmul.msk.f32.gmra.mxu2 %vm2032_vm3, %v2017_v27  ;;  %v1413_v16 = vsel %vm788_vm2, %v1411_v1, %v4708_v53 }
 0x109   : > { %v996_v44 = vadd.f32 %v964_v25, %v931_v55  ;;  %v1958_v26 = vrot.slane %v1832_v28, 2  ;;  %v459_v20 = vmul.f32 %v2500_v54, %v2599_v3  ;;  %v391_v38 = vmul.f32 %v2500_v54, %v2597_v2  ;;  %v4879_v55 = vld [vmem:[#allocation16_spill] sm:$0xff] }
 0x10a   : > { %v4712_v50 = vrot.slane %v4150_v21, 2  ;;  %v4165_v18 = vmul.f32 %v4161_v30, %v2599_v3  ;;  %v701_v25 = vmul.f32 %v2500_v54, %v2601_v4  ;;  %v1719_v63 = vsel %vm546_vm1, %v1717_v51, %v4707_v0 }
 0x10b   : > { %v1237_v14 = vadd.f32 %v1172_v43, %v996_v44  ;;  %v562_v48 = vrot.slane %v459_v20, 1  ;;  %v4173_v1 = vmul.f32 %v4161_v30, %v2601_v4  ;;  %v940_v28 = vmul.f32 %v4879_v55, %v2603_v5 }
 0x10c   : > { %v4715_v62 = vrot.slane %v4165_v18, 1  ;;  %v804_v27 = vrot.slane %v701_v25, 2  ;;  %v1008_v54 = vmul.f32 %v4879_v55, %v2605_v6  ;;  %v4183_v51 = vmul.f32 %v3766_v15, %v2605_v6 }
 0x10d   : > { %v1478_v43 = vadd.f32 %v1413_v16, %v1237_v14  ;;  %v4714_v44 = vrot.slane %v4173_v1, 2  ;;  %v1249_v20 = vmul.f32 %v4879_v55, %v2612_v7  ;;  %v1960_v25 = vsel %vm788_vm2, %v1958_v26, %v4712_v50  ;;  %v2502_v50 = vld [vmem:[%s2610_s29 + $0x78] sm:$0xff] }
 0x10e   : > { %v564_v0 = vsel %vm546_vm1, %v562_v48, %v4715_v62  ;;  %v1110_v53 = vrot.slane %v1008_v54, 1  ;;  %v4195_v16 = vmul.f32 %v3766_v15, %v2612_v7  ;;  %v4720_v55 = vrot.slane %v4183_v51, 1  ;;  %v4205_v48 = vld [vmem:[%s2610_s29 + $0x80] sm:$0xff] }
 0x10f   : > { %v1543_v14 = vadd.f32 %v1511_v32, %v1478_v43  ;;  %v665_v36 = vadd.f32 %v564_v0, %v391_v38  ;;  %v806_v40 = vsel %vm788_vm2, %v804_v27, %v4714_v44  ;;  %v1351_v33 = vrot.slane %v1249_v20, 2 }
 0x110   : > { %v4719_v26 = vrot.slane %v4195_v16, 2  ;;  %v1555_v45 = vmul.f32 %v2502_v50, %v2623_v12  ;;  %v4209_v54 = vmul.f32 %v4205_v48, %v2623_v12  ;;  %v1487_v38 = vmul.f32 %v2502_v50, %v2621_v11 }
 0x111   : > { %v1784_v32 = vadd.f32 %v1719_v63, %v1543_v14  ;;  %v907_v0 = vadd.f32 %v806_v40, %v665_v36  ;;  %v1796_v27 = vmul.f32 %v2502_v50, %v3473_v8  ;;  %v1112_v43 = vsel %vm546_vm1, %v1110_v53, %v4720_v55  ;;  %v2504_v63 = vld [vmem:[%s2610_s29 + $0xa8] sm:$0xff]  ;;  %v4231_v14 = vld [vmem:[%s2610_s29 + $0xb0] sm:$0xff] }
 0x112   : > { %4880 = vst [vmem:[#allocation13_spill] sm:$0xff] %v4209_v54  ;;  %v1657_v20 = vrot.slane %v1555_v45, 1  ;;  %v4718_v44 = vrot.slane %v4209_v54, 1  ;;  %v4219_v62 = vmul.f32 %v4205_v48, %v3473_v8  ;;  %v1353_v40 = vsel %vm788_vm2, %v1351_v33, %v4719_v26 }
 0x113   : > { %v2025_v23 = vadd.f32 %v1960_v25, %v1784_v32  ;;  %v972_v52 = vadd.f32 %v940_v28, %v907_v0  ;;  %v1898_v36 = vrot.slane %v1796_v27, 2  ;;  %v399_v45 = vmul.f32 %v2504_v63, %v2597_v2 }
 0x114   : > { %v1659_v50 = vsel %vm546_vm1, %v1657_v20, %v4718_v44  ;;  %v471_v53 = vmul.f32 %v2504_v63, %v2599_v3  ;;  %v4235_v8 = vmul.f32 %v4231_v14, %v2599_v3  ;;  %v4727_v33 = vrot.slane %v4219_v62, 2  ;;  %v4881_v20 = vld [vmem:[#allocation15_spill] sm:$0xff] }
 0x115   : > { %2436 = vmatmul.msk.f32.gmra.mxu3 %vm2032_vm3, %v2025_v23  ;;  %v1213_v28 = vadd.f32 %v1112_v43, %v972_v52  ;;  %v713_v25 = vmul.f32 %v2504_v63, %v2601_v4  ;;  %v4242_v32 = vmul.f32 %v4231_v14, %v2601_v4  ;;  %v948_v44 = vmul.f32 %v4881_v20, %v2603_v5 }
 0x116   : > { %v582_v0 = vrot.slane %v471_v53, 1  ;;  %v4724_v27 = vrot.slane %v4235_v8, 1  ;;  %v1020_v26 = vmul.f32 %v4881_v20, %v2605_v6  ;;  %v4252_v63 = vmul.f32 %v3842_v10, %v2605_v6 }
 0x117   : > { %v1454_v23 = vadd.f32 %v1353_v40, %v1213_v28  ;;  %v824_v52 = vrot.slane %v713_v25, 2  ;;  %v4729_v43 = vrot.slane %v4242_v32, 2  ;;  %v1261_v34 = vmul.f32 %v4881_v20, %v2612_v7  ;;  %v2506_v20 = vld [vmem:[%s2610_s29 + $0xd8] sm:$0xff] }
 0x118   : > { %4882 = vst [vmem:[#allocation4_spill] sm:$0xff] %v4252_v63  ;;  %v584_v53 = vsel %vm546_vm1, %v582_v0, %v4724_v27  ;;  %v1130_v55 = vrot.slane %v1020_v26, 1  ;;  %v4261_v57 = vmul.f32 %v3842_v10, %v2612_v7  ;;  %v4728_v49 = vrot.slane %v4252_v63, 1 }
 0x119   : > { %v1519_v40 = vadd.f32 %v1487_v38, %v1454_v23  ;;  %v673_v28 = vadd.f32 %v584_v53, %v399_v45  ;;  %v826_v25 = vsel %vm788_vm2, %v824_v52, %v4729_v43  ;;  %v1900_v0 = vsel %vm788_vm2, %v1898_v36, %v4727_v33  ;;  %v4274_v45 = vld [vmem:[%s2610_s29 + $0xe0] sm:$0xff]  ;;  %v4287_v36 = vld [vmem:[%s4580_s2 + $0x8] ss:$0 sm:$0xff]  ;;  %v2509_v43 = vld [vmem:[%s2610_s29 + $0x118] sm:$0x3] }
 0x11a   : > { %4883 = vst [vmem:[#allocation10_spill] sm:$0xff] %v4261_v57  ;;  %v1371_v26 = vrot.slane %v1261_v34, 2  ;;  %v4731_v27 = vrot.slane %v4261_v57, 2  ;;  %v1567_v54 = vmul.f32 %v2506_v20, %v2623_v12  ;;  %v4278_v23 = vmul.f32 %v4274_v45, %v2623_v12 }
 0x11b   : > { %v1760_v10 = vadd.f32 %v1659_v50, %v1519_v40  ;;  %v915_v38 = vadd.f32 %v826_v25, %v673_v28  ;;  %4884 = vst [vmem:[#allocation12_spill] sm:$0xff] %v4274_v45  ;;  %v1132_v52 = vsel %vm546_vm1, %v1130_v55, %v4728_v49  ;;  %v1495_v34 = vmul.f32 %v2506_v20, %v2621_v11 }
 0x11c   : > { %v1808_v50 = vmul.f32 %v4287_v36, %v2506_v20  ;;  %v4292_v53 = vmul.f32 %v4287_v36, %v4274_v45  ;;  %v1677_v25 = vrot.slane %v1567_v54, 1  ;;  %v1373_v55 = vsel %vm788_vm2, %v1371_v26, %v4731_v27 }
 0x11d   : > { %v2001_v40 = vadd.f32 %v1900_v0, %v1760_v10  ;;  %v980_v28 = vadd.f32 %v948_v44, %v915_v38  ;;  %v408_v49 = vmul.f32 %v4019_v39, %v2597_v2  ;;  %v485_v20 = vmul.f32 %v2509_v43, %v2599_v3  ;;  %v4885_v0 = vld [vmem:[#allocation18_spill] sm:$0xff] }
 0x11e   : > { %v727_v63 = vmul.f32 %v2509_v43, %v2601_v4  ;;  %v1918_v44 = vrot.slane %v1808_v50, 2  ;;  %v1919_v54 = vrot.slane %v4292_v53, 2  ;;  %v1034_v38 = vmul.f32 %v4885_v0, %v2605_v6 }
 0x11f   : > { %2412 = vmatmul.msk.f32.gmra.mxu0 %vm2032_vm3, %v2001_v40  ;;  %v1221_v10 = vadd.f32 %v1132_v52, %v980_v28  ;;  %v605_v33 = vrot.slane %v485_v20, 1  ;;  %v1275_v39 = vmul.f32 %v4885_v0, %v2612_v7  ;;  %v4886_v45 = vrot.slane %v4278_v23, 1 }
 0x120   : > { %v847_v26 = vrot.slane %v727_v63, 2  ;;  %v1153_v57 = vrot.slane %v1034_v38, 1  ;;  %v4887_v52 = vrot.slane %v4023_v59, 1  ;;  %v4888_v40 = vrot.slane %v4032_v19, 2  ;;  %v2510_v63 = vld [vmem:[%s2610_s29 + $0x148] sm:$0x3] }
 0x121   : > { %v1462_v27 = vadd.f32 %v1373_v55, %v1221_v10  ;;  %v1679_v43 = vsel %vm546_vm1, %v1677_v25, %v4886_v45  ;;  %v1581_v20 = vmul.f32 %v2510_v63, %v2623_v12  ;;  %v1822_v0 = vmul.f32 %v2510_v63, %v4287_v36 }
 0x122   : > { %v606_v50 = vsel %vm546_vm1, %v4887_v52, %v605_v33  ;;  %v848_v28 = vsel %vm788_vm2, %v4888_v40, %v847_v26  ;;  %v1920_v45 = vsel %vm788_vm2, %v1918_v44, %v1919_v54  ;;  %v957_v59 = vmul.f32 %v3612_v29, %v2603_v5  ;;  %v2511_v26 = vld [vmem:[%s2610_s29 + $0x178] sm:$0x3]  ;;  %v381_v40 = vld [vmem:[%s3640_s12 + $0x28] sm:$0x3] }
 0x123   : > { %v1527_v55 = vadd.f32 %v1495_v34, %v1462_v27  ;;  %v682_v25 = vadd.f32 %v606_v50, %v408_v49  ;;  %v4889_v33 = vrot.slane %v4047_v24, 1  ;;  %v1394_v10 = vrot.slane %v1275_v39, 2 }
 0x124   : > { %v1504_v38 = vmul.f32 %v4067_v41, %v2621_v11  ;;  %v497_v52 = vmul.f32 %v2511_v26, %v2599_v3  ;;  %v416_v49 = vmul.f32 %v4091_v17, %v2597_v2  ;;  %v739_v44 = vmul.f32 %v2511_v26, %v2601_v4  ;;  %v4358_v26 = vpop.f32.mrf.mxu2 }
 0x125   : > { %v1154_v19 = vsel %vm546_vm1, %v4889_v33, %v1153_v57  ;;  %v1768_v27 = vadd.f32 %v1679_v43, %v1527_v55  ;;  %v924_v34 = vadd.f32 %v848_v28, %v682_v25  ;;  %v1700_v29 = vrot.slane %v1581_v20, 1  ;;  %v4348_v25 = vpop.f32.mrf.mxu0 }
 0x126   : > { %v1941_v50 = vrot.slane %v1822_v0, 2  ;;  %v625_v24 = vrot.slane %v497_v52, 1  ;;  %v1046_v57 = vmul.f32 %v2605_v6, %v3904_v61  ;;  %v867_v41 = vrot.slane %v739_v44, 2  ;;  %v4360_v52 = vpop.f32.mrf.mxu3 }
 0x127   : > { %v2009_v39 = vadd.f32 %v1920_v45, %v1768_v27  ;;  %v989_v63 = vadd.f32 %v957_v59, %v924_v34  ;;  %v1287_v33 = vmul.f32 %v2612_v7, %v3904_v61  ;;  %v4890_v43 = vrot.slane %v4060_v22, 2  ;;  %v4350_v45 = vpop.f32.mrf.mxu1 }
 0x128   : > { %v4891_v17 = vrot.slane %v4095_v46, 1  ;;  %v1173_v20 = vrot.slane %v1046_v57, 1  ;;  %v1593_v0 = vmul.f32 %v2623_v12, %v381_v40  ;;  %v4892_v22 = vrot.slane %v4103_v42, 2 }
 0x129   : > { %v1395_v28 = vsel %vm788_vm2, %v4890_v43, %v1394_v10  ;;  %2420 = vmatmul.msk.f32.gmra.mxu1 %vm2032_vm3, %v2009_v39  ;;  %v1230_v59 = vadd.f32 %v1154_v19, %v989_v63  ;;  %v965_v46 = vmul.f32 %v2603_v5, %v3669_v9  ;;  %v4893_v27 = vrot.slane %v4071_v31, 1  ;;  %v2512_v39 = vld [vmem:[%s2610_s29 + $0x58] sm:$0x3] }
 0x12a   : > { %v626_v55 = vsel %vm546_vm1, %v4891_v17, %v625_v24  ;;  %v868_v10 = vsel %vm788_vm2, %v4892_v22, %v867_v41  ;;  %v4894_v44 = vrot.slane %v4079_v60, 2  ;;  %v1834_v42 = vmul.f32 %v4287_v36, %v381_v40 }
 0x12b   : > { %v690_v61 = vadd.f32 %v626_v55, %v416_v49  ;;  %v1701_v34 = vsel %vm546_vm1, %v4893_v27, %v1700_v29  ;;  %v1414_v49 = vrot.slane %v1287_v33, 2  ;;  %v1471_v24 = vadd.f32 %v1395_v28, %v1230_v59  ;;  %v2513_v27 = vld [vmem:[%s2610_s29 + $0x88] sm:$0x3] }
 0x12c   : > { %v1942_v19 = vsel %vm788_vm2, %v4894_v44, %v1941_v50  ;;  %v1512_v9 = vmul.f32 %v2621_v11, %v4114_v56  ;;  %v461_v63 = vmul.f32 %v2512_v39, %v2599_v3  ;;  %v4895_v41 = vrot.slane %v4119_v47, 1 }
 0x12d   : > { %v932_v57 = vadd.f32 %v868_v10, %v690_v61  ;;  %v1720_v29 = vrot.slane %v1593_v0, 1  ;;  %v392_v60 = vmul.f32 %v4161_v30, %v2597_v2  ;;  %v703_v50 = vmul.f32 %v2512_v39, %v2601_v4 }
 0x12e   : > { %v1174_v31 = vsel %vm546_vm1, %v4895_v41, %v1173_v20  ;;  %v1536_v40 = vadd.f32 %v1504_v38, %v1471_v24  ;;  %v565_v43 = vrot.slane %v461_v63, 1  ;;  %v1010_v56 = vmul.f32 %v3964_v37, %v2605_v6  ;;  %v2201_v24 = vpop.f32.mrf.mxu2 }
 0x12f   : > { %v997_v33 = vadd.f32 %v965_v46, %v932_v57  ;;  %v4896_v28 = vrot.slane %v4130_v13, 2  ;;  %v1961_v47 = vrot.slane %v1834_v42, 2  ;;  %v807_v55 = vrot.slane %v703_v50, 2  ;;  %v4396_v57 = vpop.f32.mrf.mxu3 }
 0x130   : > { %v1251_v20 = vmul.f32 %v3964_v37, %v2612_v7  ;;  %v1777_v0 = vadd.f32 %v1701_v34, %v1536_v40  ;;  %v4897_v59 = vrot.slane %v4165_v18, 1  ;;  %v1113_v61 = vrot.slane %v1010_v56, 1  ;;  %v2153_v37 = vpop.f32.mrf.mxu0  ;;  %v2177_v34 = vpop.f32.mrf.mxu1  ;;  %v2514_v40 = vld [vmem:[%s2610_s29 + $0xb8] sm:$0x3] }
 0x131   : > { %v1415_v17 = vsel %vm788_vm2, %v4896_v28, %v1414_v49  ;;  %v1238_v30 = vadd.f32 %v1174_v31, %v997_v33  ;;  %v4898_v10 = vrot.slane %v4173_v1, 2  ;;  %v941_v13 = vmul.f32 %v3766_v15, %v2603_v5 }
 0x132   : > { %v566_v38 = vsel %vm546_vm1, %v4897_v59, %v565_v43  ;;  %v1557_v44 = vmul.f32 %v2513_v27, %v2623_v12  ;;  %v2018_v49 = vadd.f32 %v1942_v19, %v1777_v0  ;;  %v1354_v18 = vrot.slane %v1251_v20, 2 }
 0x133   : > { %v666_v22 = vadd.f32 %v566_v38, %v392_v60  ;;  %v808_v46 = vsel %vm788_vm2, %v4898_v10, %v807_v55  ;;  %v1479_v42 = vadd.f32 %v1415_v17, %v1238_v30  ;;  %v4899_v39 = vrot.slane %v4140_v58, 1 }
 0x134   : > { %v4900_v63 = vrot.slane %v4150_v21, 2  ;;  %v1798_v31 = vmul.f32 %v2513_v27, %v4287_v36  ;;  %2429 = vmatmul.msk.f32.gmra.mxu2 %vm2032_vm3, %v2018_v49  ;;  %v4901_v60 = vrot.slane %v4183_v51, 1  ;;  %v473_v58 = vmul.f32 %v2514_v40, %v2599_v3  ;;  %v4423_v3 = vld [vmem:[%s4582_s4] ss:$0 sm:$0xff] }
 0x135   : > { %v1721_v1 = vsel %vm546_vm1, %v4899_v39, %v1720_v29  ;;  %v908_v41 = vadd.f32 %v808_v46, %v666_v22  ;;  %v1544_v19 = vadd.f32 %v1512_v9, %v1479_v42  ;;  %v715_v29 = vmul.f32 %v2514_v40, %v2601_v4  ;;  %v4907_v46 = vld [vmem:[#allocation9_spill] sm:$0xff] }
 0x136   : > { %v1962_v15 = vsel %vm788_vm2, %v4900_v63, %v1961_v47  ;;  %v1114_v50 = vsel %vm546_vm1, %v4901_v60, %v1113_v61  ;;  %v1660_v21 = vrot.slane %v1557_v44, 1  ;;  %v400_v43 = vmul.f32 %v4231_v14, %v2597_v2  ;;  %v4905_v61 = vld [vmem:[#allocation13_spill] sm:$0xff] }
 0x137   : > { %v973_v33 = vadd.f32 %v941_v13, %v908_v41  ;;  %v1022_v56 = vmul.f32 %v4003_v35, %v2605_v6  ;;  %v1785_v28 = vadd.f32 %v1721_v1, %v1544_v19  ;;  %v4902_v9 = vrot.slane %v4195_v16, 2  ;;  %v2228_v49 = vpop.f32.mrf.mxu3 }
 0x138   : > { %v585_v17 = vrot.slane %v473_v58, 1  ;;  %v827_v47 = vrot.slane %v715_v29, 2  ;;  %v1488_v2 = vmul.f32 %v4205_v48, %v2621_v11  ;;  %v1901_v14 = vrot.slane %v1798_v31, 2 }
 0x139   : > { %v1355_v51 = vsel %vm788_vm2, %v4902_v9, %v1354_v18  ;;  %v1214_v4 = vadd.f32 %v1114_v50, %v973_v33  ;;  %v1263_v6 = vmul.f32 %v4003_v35, %v2612_v7  ;;  %v2026_v16 = vadd.f32 %v1962_v15, %v1785_v28  ;;  %v2156_v7 = vpop.f32.mrf.mxu0  ;;  %v2180_v35 = vpop.f32.mrf.mxu1  ;;  %v4909_v15 = vld [vmem:[#allocation4_spill] sm:$0xff] }
 0x13a   : > { %v4903_v55 = vrot.slane %v4235_v8, 1  ;;  %v4904_v0 = vrot.slane %v4242_v32, 2  ;;  %v1133_v59 = vrot.slane %v1022_v56, 1  ;;  %v4906_v22 = vrot.slane %v4905_v61, 1  ;;  %v2515_v32 = vld [vmem:[%s2610_s29 + $0xe8] sm:$0x3] }
 0x13b   : > { %v1455_v38 = vadd.f32 %v1355_v51, %v1214_v4  ;;  %v949_v13 = vmul.f32 %v4907_v46, %v2603_v5  ;;  %2437 = vmatmul.msk.f32.gmra.mxu3 %vm2032_vm3, %v2026_v16  ;;  %v1374_v8 = vrot.slane %v1263_v6, 2  ;;  %v1569_v27 = vmul.f32 %v2515_v32, %v2623_v12  ;;  %v2204_v5 = vpop.f32.mrf.mxu2 }
 0x13c   : > { %v586_v20 = vsel %vm546_vm1, %v4903_v55, %v585_v17  ;;  %v828_v30 = vsel %vm788_vm2, %v4904_v0, %v827_v47  ;;  %v1661_v48 = vsel %vm546_vm1, %v4906_v22, %v1660_v21  ;;  %v2151_v44 = vadd.f32 %v4423_v3, %v4348_v25  ;;  %v4913_v21 = vld [vmem:[#allocation12_spill] sm:$0xff] }
 0x13d   : > { %v674_v10 = vadd.f32 %v586_v20, %v400_v43  ;;  %v1520_v42 = vadd.f32 %v1488_v2, %v1455_v38  ;;  %v4908_v18 = vrot.slane %v4219_v62, 2  ;;  %v2175_v63 = vadd.f32 %v4423_v3, %v4350_v45 }
 0x13e   : > { %v4910_v41 = vrot.slane %v4909_v15, 1  ;;  %v1810_v31 = vmul.f32 %v2515_v32, %v4287_v36  ;;  %2247 = vst.msk [vmem:[%s4443_s23] sm:$0xff] %vm2246_vm4, %v2151_v44  ;;  %v2199_v25 = vadd.f32 %v4423_v3, %v4358_v26  ;;  %v2223_v62 = vadd.f32 %v4423_v3, %v4360_v52  ;;  %v4911_v36 = vld [vmem:[#allocation10_spill] sm:$0xff] }
 0x13f   : > { %v1902_v39 = vsel %vm788_vm2, %v4908_v18, %v1901_v14  ;;  %v916_v1 = vadd.f32 %v828_v30, %v674_v10  ;;  %v1761_v19 = vadd.f32 %v1661_v48, %v1520_v42  ;;  %2255 = vst.msk [vmem:[%s4443_s23 + $0x40] sm:$0xff] %vm2246_vm4, %v2175_v63  ;;  %v2154_v45 = vadd.f32 %v4423_v3, %v2153_v37  ;;  %v2231_v6 = vpop.f32.mrf.mxu3 }
 0x140   : > { %v1134_v12 = vsel %vm546_vm1, %v4910_v41, %v1133_v59  ;;  %v2178_v50 = vadd.f32 %v4423_v3, %v2177_v34  ;;  %v4912_v40 = vrot.slane %v4911_v36, 2  ;;  %v1680_v29 = vrot.slane %v1569_v27, 1  ;;  %2263 = vst.msk [vmem:[%s4443_s23 + $0x80] sm:$0xff] %vm2246_vm4, %v2199_v25 }
 0x141   : > { %v981_v60 = vadd.f32 %v949_v13, %v916_v1  ;;  %v2202_v26 = vadd.f32 %v4423_v3, %v2201_v24  ;;  %v2002_v52 = vadd.f32 %v1902_v39, %v1761_v19  ;;  %v1496_v43 = vmul.f32 %v4913_v21, %v2621_v11  ;;  %2271 = vst.msk [vmem:[%s4443_s23 + $0xc0] sm:$0xff] %vm2246_vm4, %v2223_v62  ;;  %v2159_v28 = vpop.f32.mrf.mxu0  ;;  %v2183_v17 = vpop.f32.mrf.mxu1 }
 0x142   : > { %v1375_v58 = vsel %vm788_vm2, %v4912_v40, %v1374_v8  ;;  %v2226_v37 = vadd.f32 %v4423_v3, %v4396_v57  ;;  %v1921_v34 = vrot.slane %v1810_v31, 2  ;;  %2248 = vst.msk [vmem:[%s4443_s23 + $0x8] sm:$0xff] %vm2246_vm4, %v2154_v45  ;;  %v2157_v56 = vadd.f32 %v4423_v3, %v2156_v7 }
 0x143   : > { %v1222_v33 = vadd.f32 %v1134_v12, %v981_v60  ;;  %2413 = vmatmul.msk.f32.gmra.mxu0 %vm2032_vm3, %v2002_v52  ;;  %2256 = vst.msk [vmem:[%s4443_s23 + $0x48] sm:$0xff] %vm2246_vm4, %v2178_v50  ;;  %v2181_v11 = vadd.f32 %v4423_v3, %v2180_v35  ;;  %v4914_v9 = vrot.slane %v4278_v23, 1  ;;  %v2205_v51 = vadd.f32 %v4423_v3, %v2204_v5  ;;  %v2207_v47 = vpop.f32.mrf.mxu2 }
 0x144   : > { %2264 = vst.msk [vmem:[%s4443_s23 + $0x88] sm:$0xff] %vm2246_vm4, %v2202_v26  ;;  %v2229_v2 = vadd.f32 %v4423_v3, %v2228_v49  ;;  %v1922_v23 = vsel %vm788_vm2, %v1919_v54, %v1921_v34  ;;  %v2160_v14 = vadd.f32 %v4423_v3, %v2159_v28  ;;  %v2184_v55 = vadd.f32 %v4423_v3, %v2183_v17 }
 0x145   : > { %v1463_v24 = vadd.f32 %v1375_v58, %v1222_v33  ;;  %v1681_v57 = vsel %vm546_vm1, %v4914_v9, %v1680_v29  ;;  %2272 = vst.msk [vmem:[%s4443_s23 + $0xc8] sm:$0xff] %vm2246_vm4, %v2226_v37  ;;  %v2208_v53 = vadd.f32 %v4423_v3, %v2207_v47  ;;  %v2232_v54 = vadd.f32 %v4423_v3, %v2231_v6 }
 0x146   : > { %2249 = vst.msk [vmem:[%s4443_s23 + $0x10] sm:$0xff] %vm2246_vm4, %v2157_v56 }
 0x147   : > { %v1528_v4 = vadd.f32 %v1496_v43, %v1463_v24  ;;  %2257 = vst.msk [vmem:[%s4443_s23 + $0x50] sm:$0xff] %vm2246_vm4, %v2181_v11 }
 0x148   : > { %2265 = vst.msk [vmem:[%s4443_s23 + $0x90] sm:$0xff] %vm2246_vm4, %v2205_v51 }
 0x149   : > { %v1769_v16 = vadd.f32 %v1681_v57, %v1528_v4  ;;  %2273 = vst.msk [vmem:[%s4443_s23 + $0xd0] sm:$0xff] %vm2246_vm4, %v2229_v2 }
 0x14a   : > { %2250 = vst.msk [vmem:[%s4443_s23 + $0x18] sm:$0xff] %vm2246_vm4, %v2160_v14 }
 0x14b   : > { %v2010_v20 = vadd.f32 %v1922_v23, %v1769_v16  ;;  %2258 = vst.msk [vmem:[%s4443_s23 + $0x58] sm:$0xff] %vm2246_vm4, %v2184_v55  ;;  %v2210_v0 = vpop.f32.mrf.mxu2 }
 0x14c   : > { %2266 = vst.msk [vmem:[%s4443_s23 + $0x98] sm:$0xff] %vm2246_vm4, %v2208_v53  ;;  %v2211_v30 = vadd.f32 %v4423_v3, %v2210_v0  ;;  %v2234_v59 = vpop.f32.mrf.mxu3 }
 0x14d   : > { %2421 = vmatmul.msk.f32.gmra.mxu1 %vm2032_vm3, %v2010_v20  ;;  %2274 = vst.msk [vmem:[%s4443_s23 + $0xd8] sm:$0xff] %vm2246_vm4, %v2232_v54  ;;  %v2235_v38 = vadd.f32 %v4423_v3, %v2234_v59 }
 0x14e   : > { %2267 = vst.msk [vmem:[%s4443_s23 + $0xa0] sm:$0xff] %vm2246_vm4, %v2211_v30 }
 0x14f   : > { %2275 = vst.msk [vmem:[%s4443_s23 + $0xe0] sm:$0xff] %vm2246_vm4, %v2235_v38 }
 0x150   : > { %v2162_v61 = vpop.f32.mrf.mxu0 }
 0x151   : > { %v2163_v22 = vadd.f32 %v4423_v3, %v2162_v61 }
 0x153   : > { %2251 = vst.msk [vmem:[%s4443_s23 + $0x20] sm:$0xff] %vm2246_vm4, %v2163_v22 }
 0x15a   : > { %v2186_v48 = vpop.f32.mrf.mxu1 }
 0x15b   : > { %v2187_v10 = vadd.f32 %v4423_v3, %v2186_v48 }
 0x15d   : > { %2259 = vst.msk [vmem:[%s4443_s23 + $0x60] sm:$0xff] %vm2246_vm4, %v2187_v10 }
 0x16c   : > { %v2213_v46 = vpop.f32.mrf.mxu2 }
 0x16d   : > { %v2214_v13 = vadd.f32 %v4423_v3, %v2213_v46 }
 0x16f   : > { %2268 = vst.msk [vmem:[%s4443_s23 + $0xa8] sm:$0xff] %vm2246_vm4, %v2214_v13 }
 0x174   : > { %v2237_v7 = vpop.f32.mrf.mxu3 }
 0x175   : > { %v2238_v8 = vadd.f32 %v4423_v3, %v2237_v7 }
 0x176   : > { %v2165_v35 = vpop.f32.mrf.mxu0 }
 0x177   : > { %v2166_v32 = vadd.f32 %v4423_v3, %v2165_v35  ;;  %2276 = vst.msk [vmem:[%s4443_s23 + $0xe8] sm:$0xff] %vm2246_vm4, %v2238_v8 }
 0x179   : > { %2252 = vst.msk [vmem:[%s4443_s23 + $0x28] sm:$0xff] %vm2246_vm4, %v2166_v32 }
 0x17f   : > { %v2189_v27 = vpop.f32.mrf.mxu1 }
 0x180   : > { %v2190_v44 = vadd.f32 %v4423_v3, %v2189_v27 }
 0x182   : > { %2260 = vst.msk [vmem:[%s4443_s23 + $0x68] sm:$0xff] %vm2246_vm4, %v2190_v44 }
 0x18b   : > { %v2216_v5 = vpop.f32.mrf.mxu2 }
 0x18c   : > { %v2217_v49 = vadd.f32 %v4423_v3, %v2216_v5 }
 0x18e   : > { %2269 = vst.msk [vmem:[%s4443_s23 + $0xb0] sm:$0xff] %vm2246_vm4, %v2217_v49 }
 0x198   : > { %v2240_v42 = vpop.f32.mrf.mxu3 }
 0x199   : > { %v2241_v18 = vadd.f32 %v4423_v3, %v2240_v42 }
 0x19b   : > { %2277 = vst.msk [vmem:[%s4443_s23 + $0xf0] sm:$0xff] %vm2246_vm4, %v2241_v18 }
 0x19c   : > { %v2168_v39 = vpop.f32.mrf.mxu0 }
 0x19d   : > { %v2169_v1 = vadd.f32 %v4423_v3, %v2168_v39 }
 0x19f   : > { %2253 = vst.msk [vmem:[%s4443_s23 + $0x30] sm:$0xff] %vm2246_vm4, %v2169_v1 }
 0x1a6   : > { %v2192_v63 = vpop.f32.mrf.mxu1 }
 0x1a7   : > { %v2193_v15 = vadd.f32 %v4423_v3, %v2192_v63 }
 0x1a9   : > { %2261 = vst.msk [vmem:[%s4443_s23 + $0x70] sm:$0xff] %vm2246_vm4, %v2193_v15 }
 0x1b7   : > { %v2219_v41 = vpop.f32.mrf.mxu2 }
 0x1b8   : > { %v2220_v12 = vadd.f32 %v4423_v3, %v2219_v41 }
 0x1ba   : > { %2270 = vst.msk [vmem:[%s4443_s23 + $0xb8] sm:$0xff] %vm2246_vm4, %v2220_v12 }
 0x1be   : > { %v2243_v31 = vpop.f32.mrf.mxu3 }
 0x1bf   : > { %v2244_v62 = vadd.f32 %v4423_v3, %v2243_v31 }
 0x1c0   : > { %v2171_v25 = vpop.f32.mrf.mxu0 }
 0x1c1   : > { %v2172_v19 = vadd.f32 %v4423_v3, %v2171_v25  ;;  %2278 = vst.msk [vmem:[%s4443_s23 + $0xf8] sm:$0xff] %vm2246_vm4, %v2244_v62 }
 0x1c3   : > { %2254 = vst.msk [vmem:[%s4443_s23 + $0x38] sm:$0xff] %vm2246_vm4, %v2172_v19 }
 0x1ca   : > { %v2195_v60 = vpop.f32.mrf.mxu1 }
 0x1cb   : > { %v2196_v45 = vadd.f32 %v4423_v3, %v2195_v60 }
 0x1cd   : > { %2262 = vst.msk [vmem:[%s4443_s23 + $0x78] sm:$0xff] %vm2246_vm4, %v2196_v45 }
 0x1ce PF: > { %s15_s20 = sadd.s32 1, %s2538_s20   ;;  %s4915_s18 = smov %s2534_s19 }
 0x1cf   : > { %p12_p5 = scmp.ge.s32.totalorder %s15_s20, 4   ;;  %s4916_s19 = smov %s4918_s21 }
 0x1d1   :  { %14 = sbr.rel (!%p12_p5) target bundleno = 2 (0x2), region = 73 }

</bundles_post_ra>
